<compile_context>
chip_gen: v6e
topology: v6e:2x2x1
jax: 0.10.0
libtpu: 0.0.40
codegen_flags: <defaults>
</compile_context>

<pallas_src>
import math

import jax
import jax.numpy as jnp
from jax import lax
from jax.experimental import pallas as pl
from jax.experimental.pallas import tpu as pltpu

_SQRT_2PI = math.sqrt(2.0 * math.pi)
# > v5e's 16 MiB scoped default, comfortably < v7x's 64 MiB physical VMEM.
_VMEM_LIMIT_BYTES = 48 * 1024 * 1024


def _round_up(x, m):
    return ((x + m - 1) // m) * m


def _make_kernels(mask_flag: bool, scale: float, s_valid: int, compute_dtype):
    """Builds (v_only_kernel, full_kernel) bodies."""

    def _softmax_series(q_ref, k_ref):
        _, tq, _ = q_ref.shape
        _, sp, _ = k_ref.shape

        # Fold the softmax scale into q: an (L,E) multiply instead of (L,S).
        q = q_ref[...] * scale
        k = k_ref[...]
        # einsum('hle,hse->hls') via dot_general -- no materialized k.T.
        scores = lax.dot_general(
            q, k, (((2,), (2,)), ((0,), (0,))),
            preferred_element_type=jnp.float32)             # (Hb, Tq, Sp) f32

        row = pl.program_id(1) * tq + lax.broadcasted_iota(jnp.int32, (tq, sp), 0)
        col = lax.broadcasted_iota(jnp.int32, (tq, sp), 1)

        invalid = None
        if mask_flag:
            invalid = col > row                             # TriangularCausalMask
        if sp > s_valid:                                    # padded key columns
            pad = col >= s_valid
            invalid = pad if invalid is None else (invalid | pad)
        if invalid is not None:
            scores = jnp.where(invalid, -jnp.inf, scores)

        m = jnp.max(scores, axis=-1, keepdims=True)
        p = jnp.exp(scores - m)
        denom = jnp.sum(p, axis=-1, keepdims=True)
        series = p * pl.reciprocal(denom, approx=True)      # EUP vrcp (free slot)
        return series, row, col

    def _apply_values(series, v_ref):
        # einsum('hls,hsd->hld')
        return lax.dot_general(
            series.astype(compute_dtype), v_ref[...],
            (((2,), (1,)), ((0,), (0,))),
            preferred_element_type=jnp.float32)

    def v_only_kernel(q_ref, k_ref, v_ref, v_out_ref):
        series, _, _ = _softmax_series(q_ref, k_ref)
        v_out_ref[...] = _apply_values(series, v_ref).astype(v_out_ref.dtype)

    def full_kernel(q_ref, k_ref, v_ref, sig_ref, v_out_ref, series_ref, prior_ref):
        series, row, col = _softmax_series(q_ref, k_ref)
        out = _apply_values(series, v_ref)

        # Prior: per-row reciprocals (O(L)) instead of per-element divides (O(L*S)).
        sig = sig_ref[...]                                  # (Hb, Tq, 1), transformed
        inv_norm = pl.reciprocal(_SQRT_2PI * sig)
        neg_half_inv_var = -0.5 * pl.reciprocal(sig * sig)
        dist = (row - col).astype(jnp.float32)              # |i-j|^2 == (i-j)^2
        prior = inv_norm * jnp.exp((dist * dist) * neg_half_inv_var)

        v_out_ref[...] = out.astype(v_out_ref.dtype)
        series_ref[...] = series.astype(series_ref.dtype)
        prior_ref[...] = prior.astype(prior_ref.dtype)

    return v_only_kernel, full_kernel


def anomaly_attention(queries, keys, values, sigma, *, mask_flag=True, scale=None,
                      output_attention=False, use_bf16_matmul=False):
    """Pallas TPU implementation of AnomalyAttention.forward (attn_mask=None path).

    queries: (B, L, H, E); keys: (B, S, H, E); values: (B, S, H, D); sigma: (B, L, H).
    Returns (V, None) or (V, series, prior, sigma_broadcast).
    """
    # TODO(synk): only the attn_mask=None (triangular causal) path and
    # attention_dropout == 0.0 are implemented.
    B, L, H, E = queries.shape
    _, S, _, D = values.shape
    if mask_flag and L != S:
        raise ValueError("TriangularCausalMask path requires L == S (win_size).")
    scale_val = float(scale) if scale is not None else 1.0 / math.sqrt(E)

    f32 = jnp.float32
    cdt = jnp.bfloat16 if use_bf16_matmul else f32   # bf16 MXU feed is opt-in (accuracy)

    # Padded geometry: lane-dense S (mult of 128), L tiled in Tq rows (mult of 8).
    l8 = _round_up(L, 8)
    tq = l8 if l8 <= 256 else 256
    lp = _round_up(L, tq)
    sp = _round_up(S, 128)

    # (B, L, H, E) -> (B*H, Lp, E) etc.  One transpose+pad copy per input.
    q = jnp.transpose(queries, (0, 2, 1, 3)).reshape(B * H, L, E).astype(cdt)
    k = jnp.transpose(keys, (0, 2, 1, 3)).reshape(B * H, S, E).astype(cdt)
    v = jnp.transpose(values, (0, 2, 1, 3)).reshape(B * H, S, D).astype(cdt)
    q = jnp.pad(q, ((0, 0), (0, lp - L), (0, 0)))
    k = jnp.pad(k, ((0, 0), (0, sp - S), (0, 0)))
    v = jnp.pad(v, ((0, 0), (0, sp - S), (0, 0)))

    BH = B * H

    # Heads per grid step: largest divisor of B*H whose double-buffered blocks
    # (+ elementwise temps) stay well under the VMEM limit.
    isz = 2 if use_bf16_matmul else 4
    in_bytes = (tq * E + sp * E + sp * D) * isz + tq * 4
    out_bytes = tq * D * 4 + (2 * tq * sp * 4 if output_attention else 0)
    per_head = 2 * (in_bytes + out_bytes) + 3 * tq * sp * 4
    budget = 22 * 1024 * 1024
    hb = 1
    for cand in range(1, BH + 1):
        if BH % cand == 0 and cand * per_head <= budget:
            hb = cand

    grid = (BH // hb, lp // tq)
    q_spec = pl.BlockSpec((hb, tq, E), lambda i, j: (i, j, 0))
    k_spec = pl.BlockSpec((hb, sp, E), lambda i, j: (i, 0, 0))   # resident across j
    v_spec = pl.BlockSpec((hb, sp, D), lambda i, j: (i, 0, 0))   # resident across j
    vout_spec = pl.BlockSpec((hb, tq, D), lambda i, j: (i, j, 0))
    attn_spec = pl.BlockSpec((hb, tq, sp), lambda i, j: (i, j, 0))

    compiler_params = pltpu.CompilerParams(
        dimension_semantics=("parallel", "parallel"),
        vmem_limit_bytes=_VMEM_LIMIT_BYTES)

    v_only_kernel, full_kernel = _make_kernels(mask_flag, scale_val, S, cdt)

    if not output_attention:
        # V-only path: no series/prior/sigma stores at all.
        v_out = pl.pallas_call(
            v_only_kernel,
            out_shape=jax.ShapeDtypeStruct((BH, lp, D), f32),
            grid_spec=pltpu.PrefetchScalarGridSpec(
                num_scalar_prefetch=0, grid=grid,
                in_specs=[q_spec, k_spec, v_spec],
                out_specs=vout_spec),
            compiler_params=compiler_params,
        )(q, k, v)
        V = jnp.transpose(v_out.reshape(B, H, lp, D), (0, 2, 1, 3))[:, :L]
        return V, None

    # Sigma transform is elementwise O(B*H*L): do it once in the wrapper; the
    # kernel only consumes the per-row value and the broadcast (B,H,L,S) output
    # is produced here instead of being stored from VMEM.
    sig_t = jax.nn.sigmoid(sigma.astype(f32) * 5.0) + 1e-5       # (B, L, H)
    sig_t = jnp.power(3.0, sig_t) - 1.0
    sig_rows = jnp.transpose(sig_t, (0, 2, 1)).reshape(BH, L, 1)
    sig_rows = jnp.pad(sig_rows, ((0, 0), (0, lp - L), (0, 0)), constant_values=1.0)
    sig_spec = pl.BlockSpec((hb, tq, 1), lambda i, j: (i, j, 0))

    v_out, series, prior = pl.pallas_call(
        full_kernel,
        out_shape=(
            jax.ShapeDtypeStruct((BH, lp, D), f32),    # V
            jax.ShapeDtypeStruct((BH, lp, sp), f32),   # series
            jax.ShapeDtypeStruct((BH, lp, sp), f32),   # prior
        ),
        grid_spec=pltpu.PrefetchScalarGridSpec(
            num_scalar_prefetch=0, grid=grid,
            in_specs=[q_spec, k_spec, v_spec, sig_spec],
            out_specs=[vout_spec, attn_spec, attn_spec]),
        compiler_params=compiler_params,
    )(q, k, v, sig_rows)

    V = jnp.transpose(v_out.reshape(B, H, lp, D), (0, 2, 1, 3))[:, :L]
    series = series.reshape(B, H, lp, sp)[:, :, :L, :S]
    prior = prior.reshape(B, H, lp, sp)[:, :, :L, :S]
    sigma_b = jnp.broadcast_to(
        jnp.transpose(sig_t, (0, 2, 1))[..., None], (B, H, L, S))
    return V, series, prior, sigma_b


def _reference(queries, keys, values, sigma, scale=None):
    """Pure-JAX mirror of the PyTorch forward (mask_flag=True, output_attention=True)."""
    B, L, H, E = queries.shape
    _, S, _, D = values.shape
    scale = scale or 1.0 / math.sqrt(E)
    scores = jnp.einsum('blhe,bshe->bhls', queries, keys)
    mask = jnp.triu(jnp.ones((L, S), dtype=bool), k=1)[None, None]
    scores = jnp.where(mask, -jnp.inf, scores)
    attn = scale * scores
    sig = jnp.transpose(sigma, (0, 2, 1))                        # (B, H, L)
    sig = jax.nn.sigmoid(sig * 5.0) + 1e-5
    sig = jnp.power(3.0, sig) - 1.0
    sig = jnp.repeat(sig[..., None], S, axis=-1)                 # (B, H, L, S)
    i = jnp.arange(L)[:, None]
    j = jnp.arange(S)[None, :]
    dist = jnp.abs(i - j).astype(jnp.float32)[None, None]
    prior = 1.0 / (math.sqrt(2.0 * math.pi) * sig) * jnp.exp(-dist ** 2 / 2.0 / sig ** 2)
    series = jax.nn.softmax(attn, axis=-1)
    V = jnp.einsum('bhls,bshd->blhd', series, values)
    return V, series, prior, sig


if __name__ == "__main__":
    # Small shapes consistent with the module: win_size = L = S.
    B, L, H, E = 2, 8, 4, 32
    S, D = L, E

    key = jax.random.PRNGKey(0)
    kq, kk, kv, ks = jax.random.split(key, 4)
    queries = jax.random.normal(kq, (B, L, H, E), dtype=jnp.float32)
    keys_ = jax.random.normal(kk, (B, S, H, E), dtype=jnp.float32)
    values = jax.random.normal(kv, (B, S, H, D), dtype=jnp.float32)
    sigma = jax.random.normal(ks, (B, L, H), dtype=jnp.float32)

    V, series, prior, sigma_b = anomaly_attention(
        queries, keys_, values, sigma, output_attention=True)
    jax.block_until_ready((V, series, prior, sigma_b))

    V_ref, series_ref, prior_ref, sigma_ref = _reference(queries, keys_, values, sigma)
    # Tolerances slightly relaxed vs exact f32 because of the approx (EUP) softmax reciprocal.
    assert jnp.allclose(V, V_ref, atol=5e-3, rtol=5e-3), "V mismatch"
    assert jnp.allclose(series, series_ref, atol=2e-3, rtol=2e-3), "series mismatch"
    assert jnp.allclose(prior, prior_ref, atol=1e-3, rtol=1e-3), "prior mismatch"
    assert jnp.allclose(sigma_b, sigma_ref, atol=1e-5, rtol=1e-5), "sigma mismatch"

    # Default path (output_attention=False): V-only kernel, no attention-map stores.
    V2, none_attn = anomaly_attention(queries, keys_, values, sigma)
    jax.block_until_ready(V2)
    assert none_attn is None
    assert jnp.allclose(V2, V_ref, atol=5e-3, rtol=5e-3), "V (v-only path) mismatch"

    print("KERNEL_OK")
</pallas_src>

<mosaic_0001>
module attributes {stable_mosaic.version = 11 : i64} {
  func.func @full_kernel(%arg0: i32, %arg1: i32, %arg2: memref<8x8x32xf32, #tpu.memory_space<vmem>>, %arg3: memref<8x128x32xf32, #tpu.memory_space<vmem>>, %arg4: memref<8x128x32xf32, #tpu.memory_space<vmem>>, %arg5: memref<8x8x1xf32, #tpu.memory_space<vmem>>, %arg6: memref<8x8x32xf32, #tpu.memory_space<vmem>>, %arg7: memref<8x8x128xf32, #tpu.memory_space<vmem>>, %arg8: memref<8x8x128xf32, #tpu.memory_space<vmem>>) attributes {dimension_semantics = [#tpu.dimension_semantics<parallel>, #tpu.dimension_semantics<parallel>], iteration_bounds = array<i64: 1, 1>, scalar_prefetch = 0 : i64, scratch_operands = 0 : i64, tpu.core_type = #tpu.core_type<tc>, window_params = [{transform_indices = @transform_0, window_bounds = array<i64: 8, 8, 32>}, {transform_indices = @transform_1, window_bounds = array<i64: 8, 128, 32>}, {transform_indices = @transform_2, window_bounds = array<i64: 8, 128, 32>}, {transform_indices = @transform_3, window_bounds = array<i64: 8, 8, 1>}, {transform_indices = @transform_4, window_bounds = array<i64: 8, 8, 32>}, {transform_indices = @transform_5, window_bounds = array<i64: 8, 8, 128>}, {transform_indices = @transform_6, window_bounds = array<i64: 8, 8, 128>}]} {
    %c0 = arith.constant 0 : index
    %c0_0 = arith.constant 0 : index
    %c0_1 = arith.constant 0 : index
    %0 = vector.load %arg2[%c0, %c0_0, %c0_1] : memref<8x8x32xf32, #tpu.memory_space<vmem>>, vector<8x8x32xf32>
    %cst = arith.constant 0.176776692 : f32
    %1 = vector.broadcast %cst : f32 to vector<8x8x32xf32>
    %2 = arith.mulf %0, %1 : vector<8x8x32xf32>
    %c0_2 = arith.constant 0 : index
    %c0_3 = arith.constant 0 : index
    %c0_4 = arith.constant 0 : index
    %3 = vector.load %arg3[%c0_2, %c0_3, %c0_4] : memref<8x128x32xf32, #tpu.memory_space<vmem>>, vector<8x128x32xf32>
    %cst_5 = arith.constant dense<0.000000e+00> : vector<8x8x128xf32>
    %4 = tpu.matmul %2, %3, %cst_5 {dimension_numbers = #tpu.dot_dimension_numbers<[2], [2], [1], [1], [0, 0, 0, 1, 1, 1], [0], [0]>} : vector<8x8x32xf32>, vector<8x128x32xf32>, vector<8x8x128xf32> -> vector<8x8x128xf32>
    %c8_i32 = arith.constant 8 : i32
    %5 = arith.muli %arg1, %c8_i32 : i32
    %6 = tpu.iota {dimensions = array<i32: 0>} : vector<8x128xi32>
    %7 = vector.broadcast %5 : i32 to vector<8x128xi32>
    %8 = arith.addi %7, %6 : vector<8x128xi32>
    %9 = tpu.iota {dimensions = array<i32: 1>} : vector<8x128xi32>
    %10 = arith.cmpi sgt, %9, %8 : vector<8x128xi32>
    %c8_i32_6 = arith.constant 8 : i32
    %11 = vector.broadcast %c8_i32_6 : i32 to vector<8x128xi32>
    %12 = arith.cmpi sge, %9, %11 : vector<8x128xi32>
    %13 = arith.ori %10, %12 : vector<8x128xi1>
    %cst_7 = arith.constant 0xFF800000 : f32
    %14 = vector.shape_cast %13 : vector<8x128xi1> to vector<1x8x128xi1>
    %15 = vector.broadcast %14 : vector<1x8x128xi1> to vector<8x8x128xi1>
    %16 = vector.broadcast %cst_7 : f32 to vector<8x8x128xf32>
    %17 = arith.select %15, %16, %4 : vector<8x8x128xi1>, vector<8x8x128xf32>
    %cst_8 = arith.constant dense<0xFF800000> : vector<8x8xf32>
    %18 = vector.multi_reduction <maximumf>, %17, %cst_8 [2] : vector<8x8x128xf32> to vector<8x8xf32>
    %19 = vector.shape_cast %18 : vector<8x8xf32> to vector<8x8x1xf32>
    %20 = vector.broadcast %19 : vector<8x8x1xf32> to vector<8x8x128xf32>
    %21 = arith.subf %17, %20 : vector<8x8x128xf32>
    %22 = math.exp %21 : vector<8x8x128xf32>
    %cst_9 = arith.constant dense<0.000000e+00> : vector<8x8xf32>
    %23 = vector.multi_reduction <add>, %22, %cst_9 [2] : vector<8x8x128xf32> to vector<8x8xf32>
    %24 = vector.shape_cast %23 : vector<8x8xf32> to vector<8x8x1xf32>
    %25 = tpu.reciprocal %24 {approx = true} : vector<8x8x1xf32> -> vector<8x8x1xf32>
    %26 = vector.broadcast %25 : vector<8x8x1xf32> to vector<8x8x128xf32>
    %27 = arith.mulf %22, %26 : vector<8x8x128xf32>
    %c0_10 = arith.constant 0 : index
    %c0_11 = arith.constant 0 : index
    %c0_12 = arith.constant 0 : index
    %28 = vector.load %arg4[%c0_10, %c0_11, %c0_12] : memref<8x128x32xf32, #tpu.memory_space<vmem>>, vector<8x128x32xf32>
    %cst_13 = arith.constant dense<0.000000e+00> : vector<8x8x32xf32>
    %29 = tpu.matmul %27, %28, %cst_13 {dimension_numbers = #tpu.dot_dimension_numbers<[2], [1], [1], [2], [0, 0, 0, 1, 1, 2], [0], [0]>} : vector<8x8x128xf32>, vector<8x128x32xf32>, vector<8x8x32xf32> -> vector<8x8x32xf32>
    %c0_14 = arith.constant 0 : index
    %c0_15 = arith.constant 0 : index
    %c0_16 = arith.constant 0 : index
    %30 = vector.load %arg5[%c0_14, %c0_15, %c0_16] : memref<8x8x1xf32, #tpu.memory_space<vmem>>, vector<8x8x1xf32>
    %cst_17 = arith.constant 2.50662827 : f32
    %31 = vector.broadcast %cst_17 : f32 to vector<8x8x1xf32>
    %32 = arith.mulf %31, %30 : vector<8x8x1xf32>
    %33 = tpu.reciprocal %32 : vector<8x8x1xf32> -> vector<8x8x1xf32>
    %34 = arith.mulf %30, %30 : vector<8x8x1xf32>
    %35 = tpu.reciprocal %34 : vector<8x8x1xf32> -> vector<8x8x1xf32>
    %cst_18 = arith.constant -5.000000e-01 : f32
    %36 = vector.broadcast %cst_18 : f32 to vector<8x8x1xf32>
    %37 = arith.mulf %36, %35 : vector<8x8x1xf32>
    %38 = arith.subi %8, %9 : vector<8x128xi32>
    %39 = arith.sitofp %38 : vector<8x128xi32> to vector<8x128xf32>
    %40 = arith.mulf %39, %39 : vector<8x128xf32>
    %41 = vector.shape_cast %40 : vector<8x128xf32> to vector<1x8x128xf32>
    %42 = vector.broadcast %41 : vector<1x8x128xf32> to vector<8x8x128xf32>
    %43 = vector.broadcast %37 : vector<8x8x1xf32> to vector<8x8x128xf32>
    %44 = arith.mulf %42, %43 : vector<8x8x128xf32>
    %45 = math.exp %44 : vector<8x8x128xf32>
    %46 = vector.broadcast %33 : vector<8x8x1xf32> to vector<8x8x128xf32>
    %47 = arith.mulf %46, %45 : vector<8x8x128xf32>
    %c0_19 = arith.constant 0 : index
    %c0_20 = arith.constant 0 : index
    %c0_21 = arith.constant 0 : index
    %48 = vector.load %arg6[%c0_19, %c0_20, %c0_21] : memref<8x8x32xf32, #tpu.memory_space<vmem>>, vector<8x8x32xf32>
    tpu.vector_store %arg6[%c0_19, %c0_20, %c0_21], %29 {strides = array<i32>} : memref<8x8x32xf32, #tpu.memory_space<vmem>>, vector<8x8x32xf32>,
    %c0_22 = arith.constant 0 : index
    %c0_23 = arith.constant 0 : index
    %c0_24 = arith.constant 0 : index
    %49 = vector.load %arg7[%c0_22, %c0_23, %c0_24] : memref<8x8x128xf32, #tpu.memory_space<vmem>>, vector<8x8x128xf32>
    tpu.vector_store %arg7[%c0_22, %c0_23, %c0_24], %27 {strides = array<i32>} : memref<8x8x128xf32, #tpu.memory_space<vmem>>, vector<8x8x128xf32>,
    %c0_25 = arith.constant 0 : index
    %c0_26 = arith.constant 0 : index
    %c0_27 = arith.constant 0 : index
    %50 = vector.load %arg8[%c0_25, %c0_26, %c0_27] : memref<8x8x128xf32, #tpu.memory_space<vmem>>, vector<8x8x128xf32>
    tpu.vector_store %arg8[%c0_25, %c0_26, %c0_27], %47 {strides = array<i32>} : memref<8x8x128xf32, #tpu.memory_space<vmem>>, vector<8x8x128xf32>,
    return
  }
  func.func @transform_0(%arg0: i32, %arg1: i32) -> (i32, i32, i32) {
    %c0_i32 = arith.constant 0 : i32
    %c0_i32_0 = arith.constant 0 : i32
    return %arg0, %arg1, %c0_i32 : i32, i32, i32
  }
  func.func @transform_1(%arg0: i32, %arg1: i32) -> (i32, i32, i32) {
    %c0_i32 = arith.constant 0 : i32
    %c0_i32_0 = arith.constant 0 : i32
    %c0_i32_1 = arith.constant 0 : i32
    return %arg0, %c0_i32, %c0_i32_0 : i32, i32, i32
  }
  func.func @transform_2(%arg0: i32, %arg1: i32) -> (i32, i32, i32) {
    %c0_i32 = arith.constant 0 : i32
    %c0_i32_0 = arith.constant 0 : i32
    %c0_i32_1 = arith.constant 0 : i32
    return %arg0, %c0_i32, %c0_i32_0 : i32, i32, i32
  }
  func.func @transform_3(%arg0: i32, %arg1: i32) -> (i32, i32, i32) {
    %c0_i32 = arith.constant 0 : i32
    %c0_i32_0 = arith.constant 0 : i32
    return %arg0, %arg1, %c0_i32 : i32, i32, i32
  }
  func.func @transform_4(%arg0: i32, %arg1: i32) -> (i32, i32, i32) {
    %c0_i32 = arith.constant 0 : i32
    %c0_i32_0 = arith.constant 0 : i32
    return %arg0, %arg1, %c0_i32 : i32, i32, i32
  }
  func.func @transform_5(%arg0: i32, %arg1: i32) -> (i32, i32, i32) {
    %c0_i32 = arith.constant 0 : i32
    %c0_i32_0 = arith.constant 0 : i32
    return %arg0, %arg1, %c0_i32 : i32, i32, i32
  }
  func.func @transform_6(%arg0: i32, %arg1: i32) -> (i32, i32, i32) {
    %c0_i32 = arith.constant 0 : i32
    %c0_i32_0 = arith.constant 0 : i32
    return %arg0, %arg1, %c0_i32 : i32, i32, i32
  }
}

</mosaic_0001>

<bundles_post_ra>
// kernel: tpu_custom_call.1
= control target key start
LH: loop header
LB: loop body
LE: loop exit
PB: predicated region body
PF: predicated region fallthrough
CT: control target
= control target key end

     0   :  { %12 = vsyncpa [#allocation3], 0  ;;  %vm166_vm0 = vcmask 261120   ;;  %v3271_v2 = vmov 0.0   ;;  %vm3272_vm1 = vmmov 0   ;;  %s4708_s0 = inlined_call_operand.vmem [shape: f32[8,8,32], index: 0, kind: input, shape index: {}]   ;;  %s4709_s1 = inlined_call_operand.vmem [shape: f32[8,128,32], index: 1, kind: input, shape index: {}]   ;;  %s4710_s2 = inlined_call_operand.vmem [shape: f32[8,128,32], index: 2, kind: input, shape index: {}]   ;;  %s4711_s3 = inlined_call_operand.vmem [shape: f32[8,8,1], index: 3, kind: input, shape index: {}]   ;;  %s4712_s4 = inlined_call_operand.hbm [shape: f32[8,8,32], index: 4, kind: output, shape index: {0}]   ;;  %s4713_s5 = inlined_call_operand.hbm [shape: f32[8,8,128], index: 5, kind: output, shape index: {1}]   ;;  %s4714_s6 = inlined_call_operand.hbm [shape: f32[8,8,128], index: 6, kind: output, shape index: {2}]  }
   0x1   :  { %v53_v0 = vld [vmem:[%s4709_s1 + $0x78] sm:$0xff]  ;;  %2557 = vmatprep.subr.mxu0 %v3271_v2  ;;  %2592 = vmatprep.subr.mxu1 %v3271_v2  ;;  %v52_v3 = vld [vmem:[%s4709_s1 + $0x70] sm:$0xff]  ;;  %v51_v5 = vld [vmem:[%s4709_s1 + $0x68] sm:$0xff] }
   0x2   :  { %v69_v1 = vld [vmem:[%s4709_s1 + $0xf8] sm:$0xff]  ;;  %2558 = vmatpush3.xpose.msk.msra.mxu0 %vm166_vm0, %v53_v0  ;;  %v68_v4 = vld [vmem:[%s4709_s1 + $0xf0] sm:$0xff]  ;;  %2589 = vmatprep.mubr.msk.f32.mxu0 %vm3272_vm1, %v3271_v2  ;;  %v67_v6 = vld [vmem:[%s4709_s1 + $0xe8] sm:$0xff] }
   0x3   :  { %2593 = vmatpush3.xpose.msk.msra.mxu1 %vm166_vm0, %v69_v1  ;;  %2559 = vmatprep.subr.mxu0 %v3271_v2  ;;  %v50_v7 = vld [vmem:[%s4709_s1 + $0x60] sm:$0xff]  ;;  %v49_v9 = vld [vmem:[%s4709_s1 + $0x58] sm:$0xff]  ;;  %v48_v11 = vld [vmem:[%s4709_s1 + $0x50] sm:$0xff] }
   0x4   :  { %2594 = vmatprep.subr.mxu1 %v3271_v2  ;;  %2624 = vmatprep.mubr.msk.f32.mxu1 %vm3272_vm1, %v3271_v2  ;;  %v66_v8 = vld [vmem:[%s4709_s1 + $0xe0] sm:$0xff]  ;;  %v65_v10 = vld [vmem:[%s4709_s1 + $0xd8] sm:$0xff]  ;;  %v64_v12 = vld [vmem:[%s4709_s1 + $0xd0] sm:$0xff] }
   0x5   :  { %v47_v13 = vld [vmem:[%s4709_s1 + $0x48] sm:$0xff]  ;;  %v46_v15 = vld [vmem:[%s4709_s1 + $0x40] sm:$0xff] }
   0x6   :  { %2560 = vmatpush3.xpose.msk.msra.mxu0 %vm166_vm0, %v52_v3  ;;  %v63_v14 = vld [vmem:[%s4709_s1 + $0xc8] sm:$0xff]  ;;  %v62_v16 = vld [vmem:[%s4709_s1 + $0xc0] sm:$0xff] }
   0x7   :  { %2595 = vmatpush3.xpose.msk.msra.mxu1 %vm166_vm0, %v68_v4  ;;  %2561 = vmatprep.subr.mxu0 %v3271_v2 }
   0x8   :  { %2596 = vmatprep.subr.mxu1 %v3271_v2 }
   0xa   :  { %2562 = vmatpush3.xpose.msk.msra.mxu0 %vm166_vm0, %v51_v5 }
   0xb   :  { %2597 = vmatpush3.xpose.msk.msra.mxu1 %vm166_vm0, %v67_v6  ;;  %2563 = vmatprep.subr.mxu0 %v3271_v2 }
   0xc   :  { %2598 = vmatprep.subr.mxu1 %v3271_v2 }
   0xe   :  { %2564 = vmatpush3.xpose.msk.msra.mxu0 %vm166_vm0, %v50_v7 }
   0xf   :  { %2599 = vmatpush3.xpose.msk.msra.mxu1 %vm166_vm0, %v66_v8  ;;  %2565 = vmatprep.subr.mxu0 %v3271_v2 }
  0x10   :  { %2600 = vmatprep.subr.mxu1 %v3271_v2 }
  0x12   :  { %2566 = vmatpush3.xpose.msk.msra.mxu0 %vm166_vm0, %v49_v9 }
  0x13   :  { %2601 = vmatpush3.xpose.msk.msra.mxu1 %vm166_vm0, %v65_v10  ;;  %2567 = vmatprep.subr.mxu0 %v3271_v2 }
  0x14   :  { %2602 = vmatprep.subr.mxu1 %v3271_v2 }
  0x16   :  { %2568 = vmatpush3.xpose.msk.msra.mxu0 %vm166_vm0, %v48_v11 }
  0x17   :  { %2603 = vmatpush3.xpose.msk.msra.mxu1 %vm166_vm0, %v64_v12  ;;  %2569 = vmatprep.subr.mxu0 %v3271_v2 }
  0x18   :  { %2604 = vmatprep.subr.mxu1 %v3271_v2 }
  0x1a   :  { %2570 = vmatpush3.xpose.msk.msra.mxu0 %vm166_vm0, %v47_v13 }
  0x1b   :  { %2605 = vmatpush3.xpose.msk.msra.mxu1 %vm166_vm0, %v63_v14  ;;  %2571 = vmatprep.subr.mxu0 %v3271_v2 }
  0x1c   :  { %2606 = vmatprep.subr.mxu1 %v3271_v2 }
  0x1d   :  { %13 = vsyncpa [#allocation5], 0  ;;  %v45_v17 = vld [vmem:[%s4709_s1 + $0x38] sm:$0xff]  ;;  %v44_v19 = vld [vmem:[%s4709_s1 + $0x30] sm:$0xff]  ;;  %v1136_v10 = vlaneseq }
  0x1e   :  { %2572 = vmatpush3.xpose.msk.msra.mxu0 %vm166_vm0, %v46_v15  ;;  %v61_v18 = vld [vmem:[%s4709_s1 + $0xb8] sm:$0xff]  ;;  %v60_v20 = vld [vmem:[%s4709_s1 + $0xb0] sm:$0xff]  ;;  %v43_v21 = vld [vmem:[%s4709_s1 + $0x28] sm:$0xff] }
  0x1f   :  { %2607 = vmatpush3.xpose.msk.msra.mxu1 %vm166_vm0, %v62_v16  ;;  %2573 = vmatprep.subr.mxu0 %v3271_v2  ;;  %v59_v22 = vld [vmem:[%s4709_s1 + $0xa8] sm:$0xff]  ;;  %v42_v23 = vld [vmem:[%s4709_s1 + $0x20] sm:$0xff]  ;;  %v41_v25 = vld [vmem:[%s4709_s1 + $0x18] sm:$0xff]  ;;  %v3666_v13 = vshrl.u32 %v1136_v10, 7  ;;  %v3668_v14 = vand.u32 127, %v1136_v10 }
  0x20   :  { %2608 = vmatprep.subr.mxu1 %v3271_v2  ;;  %v58_v24 = vld [vmem:[%s4709_s1 + $0xa0] sm:$0xff]  ;;  %v57_v26 = vld [vmem:[%s4709_s1 + $0x98] sm:$0xff]  ;;  %v40_v27 = vld [vmem:[%s4709_s1 + $0x10] sm:$0xff] }
  0x21   :  { %v56_v28 = vld [vmem:[%s4709_s1 + $0x90] sm:$0xff]  ;;  %v39_v29 = vld [vmem:[%s4709_s1 + $0x8] sm:$0xff]  ;;  %v22_v31 = vld [vmem:[%s4708_s0] sm:$0xff]  ;;  %vm1142_vm2 = vcmp.gt.s32.totalorder %v3668_v14, %v3666_v13  ;;  %vm1143_vm3 = vcmp.ge.s32.totalorder %v3668_v14, 8 }
  0x22   :  { %2574 = vmatpush3.xpose.msk.msra.mxu0 %vm166_vm0, %v45_v17  ;;  %v55_v30 = vld [vmem:[%s4709_s1 + $0x88] sm:$0xff]  ;;  %v38_v33 = vld [vmem:[%s4709_s1] sm:$0xff]  ;;  %v30_v35 = vmul.f32 0.17677669, %v22_v31  ;;  %v85_v37 = vld [vmem:[%s4709_s1 + $0x178] sm:$0xff]  ;;  %v1963_v17 = vsub.s32 %v3666_v13, %v3668_v14 }
  0x23   :  { %2609 = vmatpush3.xpose.msk.msra.mxu1 %vm166_vm0, %v61_v18  ;;  %2575 = vmatprep.subr.mxu0 %v3271_v2  ;;  %v23_v32 = vld [vmem:[%s4708_s0 + $0x8] sm:$0xff]  ;;  %v54_v34 = vld [vmem:[%s4709_s1 + $0x80] sm:$0xff]  ;;  %v101_v38 = vld [vmem:[%s4709_s1 + $0x1f8] sm:$0xff] }
  0x24   :  { %2610 = vmatprep.subr.mxu1 %v3271_v2  ;;  %v31_v36 = vmul.f32 0.17677669, %v23_v32  ;;  %v84_v39 = vld [vmem:[%s4709_s1 + $0x170] sm:$0xff]  ;;  %v83_v41 = vld [vmem:[%s4709_s1 + $0x168] sm:$0xff]  ;;  %v82_v43 = vld [vmem:[%s4709_s1 + $0x160] sm:$0xff] }
  0x25   :  { %v100_v40 = vld [vmem:[%s4709_s1 + $0x1f0] sm:$0xff]  ;;  %v99_v42 = vld [vmem:[%s4709_s1 + $0x1e8] sm:$0xff]  ;;  %v98_v44 = vld [vmem:[%s4709_s1 + $0x1e0] sm:$0xff] }
  0x26   :  { %2576 = vmatpush3.xpose.msk.msra.mxu0 %vm166_vm0, %v44_v19  ;;  %v81_v45 = vld [vmem:[%s4709_s1 + $0x158] sm:$0xff]  ;;  %v80_v47 = vld [vmem:[%s4709_s1 + $0x150] sm:$0xff]  ;;  %v79_v49 = vld [vmem:[%s4709_s1 + $0x148] sm:$0xff] }
  0x27   :  { %2611 = vmatpush3.xpose.msk.msra.mxu1 %vm166_vm0, %v60_v20  ;;  %2577 = vmatprep.subr.mxu0 %v3271_v2  ;;  %v97_v46 = vld [vmem:[%s4709_s1 + $0x1d8] sm:$0xff]  ;;  %v96_v48 = vld [vmem:[%s4709_s1 + $0x1d0] sm:$0xff]  ;;  %v95_v50 = vld [vmem:[%s4709_s1 + $0x1c8] sm:$0xff] }
  0x28   :  { %2612 = vmatprep.subr.mxu1 %v3271_v2  ;;  %v78_v51 = vld [vmem:[%s4709_s1 + $0x140] sm:$0xff]  ;;  %v77_v53 = vld [vmem:[%s4709_s1 + $0x138] sm:$0xff]  ;;  %v76_v55 = vld [vmem:[%s4709_s1 + $0x130] sm:$0xff] }
  0x29   :  { %v94_v52 = vld [vmem:[%s4709_s1 + $0x1c0] sm:$0xff]  ;;  %v93_v54 = vld [vmem:[%s4709_s1 + $0x1b8] sm:$0xff]  ;;  %v92_v56 = vld [vmem:[%s4709_s1 + $0x1b0] sm:$0xff] }
  0x2a   :  { %2578 = vmatpush3.xpose.msk.msra.mxu0 %vm166_vm0, %v43_v21  ;;  %v75_v57 = vld [vmem:[%s4709_s1 + $0x128] sm:$0xff]  ;;  %v74_v59 = vld [vmem:[%s4709_s1 + $0x120] sm:$0xff]  ;;  %v73_v61 = vld [vmem:[%s4709_s1 + $0x118] sm:$0xff] }
  0x2b   :  { %2613 = vmatpush3.xpose.msk.msra.mxu1 %vm166_vm0, %v59_v22  ;;  %2579 = vmatprep.subr.mxu0 %v3271_v2  ;;  %v91_v58 = vld [vmem:[%s4709_s1 + $0x1a8] sm:$0xff]  ;;  %v90_v60 = vld [vmem:[%s4709_s1 + $0x1a0] sm:$0xff]  ;;  %v89_v62 = vld [vmem:[%s4709_s1 + $0x198] sm:$0xff] }
  0x2c   :  { %2614 = vmatprep.subr.mxu1 %v3271_v2  ;;  %v72_v63 = vld [vmem:[%s4709_s1 + $0x110] sm:$0xff]  ;;  %v71_v1 = vld [vmem:[%s4709_s1 + $0x108] sm:$0xff]  ;;  %v25_v5 = vld [vmem:[%s4708_s0 + $0x18] sm:$0xff] }
  0x2d   :  { %v88_v0 = vld [vmem:[%s4709_s1 + $0x190] sm:$0xff]  ;;  %v87_v3 = vld [vmem:[%s4709_s1 + $0x188] sm:$0xff]  ;;  %v70_v6 = vld [vmem:[%s4709_s1 + $0x100] sm:$0xff]  ;;  %v33_v9 = vmul.f32 0.17677669, %v25_v5 }
  0x2e   :  { %2580 = vmatpush3.xpose.msk.msra.mxu0 %vm166_vm0, %v42_v23  ;;  %v24_v4 = vld [vmem:[%s4708_s0 + $0x10] sm:$0xff]  ;;  %v86_v7 = vld [vmem:[%s4709_s1 + $0x180] sm:$0xff]  ;;  %v117_v11 = vld [vmem:[%s4709_s1 + $0x278] sm:$0xff] }
  0x2f   :  { %2615 = vmatpush3.xpose.msk.msra.mxu1 %vm166_vm0, %v58_v24  ;;  %2581 = vmatprep.subr.mxu0 %v3271_v2  ;;  %v32_v8 = vmul.f32 0.17677669, %v24_v4  ;;  %v133_v12 = vld [vmem:[%s4709_s1 + $0x2f8] sm:$0xff]  ;;  %v116_v15 = vld [vmem:[%s4709_s1 + $0x270] sm:$0xff]  ;;  %v115_v18 = vld [vmem:[%s4709_s1 + $0x268] sm:$0xff] }
  0x30   :  { %2616 = vmatprep.subr.mxu1 %v3271_v2  ;;  %v132_v16 = vld [vmem:[%s4709_s1 + $0x2f0] sm:$0xff]  ;;  %v131_v19 = vld [vmem:[%s4709_s1 + $0x2e8] sm:$0xff]  ;;  %v114_v20 = vld [vmem:[%s4709_s1 + $0x260] sm:$0xff] }
  0x31   :  { %v130_v21 = vld [vmem:[%s4709_s1 + $0x2e0] sm:$0xff]  ;;  %v113_v22 = vld [vmem:[%s4709_s1 + $0x258] sm:$0xff]  ;;  %v112_v24 = vld [vmem:[%s4709_s1 + $0x250] sm:$0xff] }
  0x32   :  { %2582 = vmatpush3.xpose.msk.msra.mxu0 %vm166_vm0, %v41_v25  ;;  %v129_v23 = vld [vmem:[%s4709_s1 + $0x2d8] sm:$0xff]  ;;  %v128_v25 = vld [vmem:[%s4709_s1 + $0x2d0] sm:$0xff]  ;;  %v154_v10 = vld [vmem:[%s4709_s1 + $0x3a0] sm:$0xff] }
  0x33   :  { %2617 = vmatpush3.xpose.msk.msra.mxu1 %vm166_vm0, %v57_v26  ;;  %2583 = vmatprep.subr.mxu0 %v3271_v2  ;;  %v111_v26 = vld [vmem:[%s4709_s1 + $0x248] sm:$0xff]  ;;  %v125_v31 = vld [vmem:[%s4709_s1 + $0x2b8] sm:$0xff]  ;;  %v108_v32 = vld [vmem:[%s4709_s1 + $0x230] sm:$0xff] }
  0x34   :  { %2618 = vmatprep.subr.mxu1 %v3271_v2  ;;  %v157_v4 = vld [vmem:[%s4709_s1 + $0x3b8] sm:$0xff]  ;;  %v140_v5 = vld [vmem:[%s4709_s1 + $0x330] sm:$0xff]  ;;  %vm4009_vm4 = vmor %vm1142_vm2, %vm1143_vm3 }
  0x36   :  { %2584 = vmatpush3.xpose.msk.msra.mxu0 %vm166_vm0, %v40_v27  ;;  %v127_v27 = vld [vmem:[%s4709_s1 + $0x2c8] sm:$0xff] }
  0x37   :  { %2619 = vmatpush3.xpose.msk.msra.mxu1 %vm166_vm0, %v56_v28  ;;  %2585 = vmatprep.subr.mxu0 %v3271_v2  ;;  %v110_v28 = vld [vmem:[%s4709_s1 + $0x240] sm:$0xff] }
  0x38   :  { %2620 = vmatprep.subr.mxu1 %v3271_v2 }
  0x3a   :  { %2586 = vmatpush3.xpose.msk.msra.mxu0 %vm166_vm0, %v39_v29  ;;  %v126_v29 = vld [vmem:[%s4709_s1 + $0x2c0] sm:$0xff] }
  0x3b   :  { %2621 = vmatpush3.xpose.msk.msra.mxu1 %vm166_vm0, %v55_v30  ;;  %2587 = vmatprep.subr.mxu0 %v3271_v2  ;;  %v109_v30 = vld [vmem:[%s4709_s1 + $0x238] sm:$0xff] }
  0x3c   :  { %2622 = vmatprep.subr.mxu1 %v3271_v2 }
  0x3e   :  { %2588 = vmatpush3.xpose.msk.msra.mxu0 %vm166_vm0, %v38_v33  ;;  %v124_v33 = vld [vmem:[%s4709_s1 + $0x2b0] sm:$0xff] }
  0x3f   :  { %2623 = vmatpush3.xpose.msk.msra.mxu1 %vm166_vm0, %v54_v34  ;;  %2627 = vmatprep.subr.mxu0 %v3271_v2  ;;  %v107_v34 = vld [vmem:[%s4709_s1 + $0x228] sm:$0xff] }
  0x40   :  { %2662 = vmatprep.subr.mxu1 %v3271_v2 }
  0x41   :  { %2590 = vmatmul.mubr.msk.f32.vlgmr.msra.gmra.mxu0 %vm166_vm0, %v30_v35  ;;  %v123_v35 = vld [vmem:[%s4709_s1 + $0x2a8] sm:$0xff] }
  0x42   :  { %2625 = vmatmul.mubr.msk.f32.vlgmr.msra.gmra.mxu1 %vm166_vm0, %v31_v36  ;;  %2628 = vmatpush3.xpose.msk.msra.mxu0 %vm166_vm0, %v85_v37  ;;  %v106_v36 = vld [vmem:[%s4709_s1 + $0x220] sm:$0xff] }
  0x43   :  { %2663 = vmatpush3.xpose.msk.msra.mxu1 %vm166_vm0, %v101_v38  ;;  %2629 = vmatprep.subr.mxu0 %v3271_v2  ;;  %v122_v37 = vld [vmem:[%s4709_s1 + $0x2a0] sm:$0xff]  ;;  %v105_v38 = vld [vmem:[%s4709_s1 + $0x218] sm:$0xff] }
  0x44   :  { %2664 = vmatprep.subr.mxu1 %v3271_v2  ;;  %2659 = vmatprep.mubr.msk.f32.mxu0 %vm3272_vm1, %v3271_v2 }
  0x45   :  { %2694 = vmatprep.mubr.msk.f32.mxu1 %vm3272_vm1, %v3271_v2 }
  0x46   :  { %2630 = vmatpush3.xpose.msk.msra.mxu0 %vm166_vm0, %v84_v39  ;;  %v121_v39 = vld [vmem:[%s4709_s1 + $0x298] sm:$0xff] }
  0x47   :  { %2665 = vmatpush3.xpose.msk.msra.mxu1 %vm166_vm0, %v100_v40  ;;  %2631 = vmatprep.subr.mxu0 %v3271_v2  ;;  %v104_v40 = vld [vmem:[%s4709_s1 + $0x210] sm:$0xff] }
  0x48   :  { %2666 = vmatprep.subr.mxu1 %v3271_v2 }
  0x4a   :  { %2632 = vmatpush3.xpose.msk.msra.mxu0 %vm166_vm0, %v83_v41  ;;  %v120_v41 = vld [vmem:[%s4709_s1 + $0x290] sm:$0xff] }
  0x4b   :  { %2667 = vmatpush3.xpose.msk.msra.mxu1 %vm166_vm0, %v99_v42  ;;  %2633 = vmatprep.subr.mxu0 %v3271_v2  ;;  %v103_v42 = vld [vmem:[%s4709_s1 + $0x208] sm:$0xff] }
  0x4c   :  { %2668 = vmatprep.subr.mxu1 %v3271_v2 }
  0x4e   :  { %2634 = vmatpush3.xpose.msk.msra.mxu0 %vm166_vm0, %v82_v43  ;;  %v119_v43 = vld [vmem:[%s4709_s1 + $0x288] sm:$0xff] }
  0x4f   :  { %2669 = vmatpush3.xpose.msk.msra.mxu1 %vm166_vm0, %v98_v44  ;;  %2635 = vmatprep.subr.mxu0 %v3271_v2  ;;  %v26_v44 = vld [vmem:[%s4708_s0 + $0x20] sm:$0xff] }
  0x50   :  { %2670 = vmatprep.subr.mxu1 %v3271_v2 }
  0x52   :  { %2636 = vmatpush3.xpose.msk.msra.mxu0 %vm166_vm0, %v81_v45  ;;  %v27_v45 = vld [vmem:[%s4708_s0 + $0x28] sm:$0xff] }
  0x53   :  { %2671 = vmatpush3.xpose.msk.msra.mxu1 %vm166_vm0, %v97_v46  ;;  %2637 = vmatprep.subr.mxu0 %v3271_v2  ;;  %v102_v46 = vld [vmem:[%s4709_s1 + $0x200] sm:$0xff] }
  0x54   :  { %2672 = vmatprep.subr.mxu1 %v3271_v2 }
  0x56   :  { %2638 = vmatpush3.xpose.msk.msra.mxu0 %vm166_vm0, %v80_v47  ;;  %v118_v47 = vld [vmem:[%s4709_s1 + $0x280] sm:$0xff] }
  0x57   :  { %2673 = vmatpush3.xpose.msk.msra.mxu1 %vm166_vm0, %v96_v48  ;;  %2639 = vmatprep.subr.mxu0 %v3271_v2  ;;  %v34_v48 = vmul.f32 0.17677669, %v26_v44 }
  0x58   :  { %2674 = vmatprep.subr.mxu1 %v3271_v2 }
  0x5a   :  { %2640 = vmatpush3.xpose.msk.msra.mxu0 %vm166_vm0, %v79_v49  ;;  %v35_v49 = vmul.f32 0.17677669, %v27_v45 }
  0x5b   :  { %2675 = vmatpush3.xpose.msk.msra.mxu1 %vm166_vm0, %v95_v50  ;;  %2641 = vmatprep.subr.mxu0 %v3271_v2  ;;  %v149_v50 = vld [vmem:[%s4709_s1 + $0x378] sm:$0xff] }
  0x5c   :  { %2676 = vmatprep.subr.mxu1 %v3271_v2 }
  0x5e   :  { %2642 = vmatpush3.xpose.msk.msra.mxu0 %vm166_vm0, %v78_v51  ;;  %v165_v51 = vld [vmem:[%s4709_s1 + $0x3f8] sm:$0xff] }
  0x5f   :  { %2677 = vmatpush3.xpose.msk.msra.mxu1 %vm166_vm0, %v94_v52  ;;  %2643 = vmatprep.subr.mxu0 %v3271_v2  ;;  %v148_v52 = vld [vmem:[%s4709_s1 + $0x370] sm:$0xff] }
  0x60   :  { %2678 = vmatprep.subr.mxu1 %v3271_v2 }
  0x62   :  { %2644 = vmatpush3.xpose.msk.msra.mxu0 %vm166_vm0, %v77_v53  ;;  %v164_v53 = vld [vmem:[%s4709_s1 + $0x3f0] sm:$0xff] }
  0x63   :  { %2679 = vmatpush3.xpose.msk.msra.mxu1 %vm166_vm0, %v93_v54  ;;  %2645 = vmatprep.subr.mxu0 %v3271_v2  ;;  %v147_v54 = vld [vmem:[%s4709_s1 + $0x368] sm:$0xff] }
  0x64   :  { %2680 = vmatprep.subr.mxu1 %v3271_v2 }
  0x66   :  { %2646 = vmatpush3.xpose.msk.msra.mxu0 %vm166_vm0, %v76_v55  ;;  %v163_v55 = vld [vmem:[%s4709_s1 + $0x3e8] sm:$0xff] }
  0x67   :  { %2681 = vmatpush3.xpose.msk.msra.mxu1 %vm166_vm0, %v92_v56  ;;  %2647 = vmatprep.subr.mxu0 %v3271_v2  ;;  %v146_v56 = vld [vmem:[%s4709_s1 + $0x360] sm:$0xff] }
  0x68   :  { %2682 = vmatprep.subr.mxu1 %v3271_v2 }
  0x6a   :  { %2648 = vmatpush3.xpose.msk.msra.mxu0 %vm166_vm0, %v75_v57  ;;  %v162_v57 = vld [vmem:[%s4709_s1 + $0x3e0] sm:$0xff] }
  0x6b   :  { %2683 = vmatpush3.xpose.msk.msra.mxu1 %vm166_vm0, %v91_v58  ;;  %2649 = vmatprep.subr.mxu0 %v3271_v2  ;;  %v145_v58 = vld [vmem:[%s4709_s1 + $0x358] sm:$0xff] }
  0x6c   :  { %2684 = vmatprep.subr.mxu1 %v3271_v2 }
  0x6e   :  { %2650 = vmatpush3.xpose.msk.msra.mxu0 %vm166_vm0, %v74_v59  ;;  %v161_v59 = vld [vmem:[%s4709_s1 + $0x3d8] sm:$0xff] }
  0x6f   :  { %2685 = vmatpush3.xpose.msk.msra.mxu1 %vm166_vm0, %v90_v60  ;;  %2651 = vmatprep.subr.mxu0 %v3271_v2  ;;  %v144_v60 = vld [vmem:[%s4709_s1 + $0x350] sm:$0xff] }
  0x70   :  { %2686 = vmatprep.subr.mxu1 %v3271_v2 }
  0x72   :  { %2652 = vmatpush3.xpose.msk.msra.mxu0 %vm166_vm0, %v73_v61  ;;  %v160_v61 = vld [vmem:[%s4709_s1 + $0x3d0] sm:$0xff] }
  0x73   :  { %2687 = vmatpush3.xpose.msk.msra.mxu1 %vm166_vm0, %v89_v62  ;;  %2653 = vmatprep.subr.mxu0 %v3271_v2  ;;  %v143_v62 = vld [vmem:[%s4709_s1 + $0x348] sm:$0xff] }
  0x74   :  { %2688 = vmatprep.subr.mxu1 %v3271_v2 }
  0x76   :  { %2654 = vmatpush3.xpose.msk.msra.mxu0 %vm166_vm0, %v72_v63  ;;  %v159_v63 = vld [vmem:[%s4709_s1 + $0x3c8] sm:$0xff] }
  0x77   :  { %2689 = vmatpush3.xpose.msk.msra.mxu1 %vm166_vm0, %v88_v0  ;;  %2655 = vmatprep.subr.mxu0 %v3271_v2  ;;  %v142_v0 = vld [vmem:[%s4709_s1 + $0x340] sm:$0xff] }
  0x78   :  { %2690 = vmatprep.subr.mxu1 %v3271_v2 }
  0x7a   :  { %2656 = vmatpush3.xpose.msk.msra.mxu0 %vm166_vm0, %v71_v1  ;;  %v158_v1 = vld [vmem:[%s4709_s1 + $0x3c0] sm:$0xff] }
  0x7b   :  { %2691 = vmatpush3.xpose.msk.msra.mxu1 %vm166_vm0, %v87_v3  ;;  %2657 = vmatprep.subr.mxu0 %v3271_v2  ;;  %v141_v3 = vld [vmem:[%s4709_s1 + $0x338] sm:$0xff] }
  0x7c   :  { %2692 = vmatprep.subr.mxu1 %v3271_v2 }
  0x7e   :  { %2658 = vmatpush3.xpose.msk.msra.mxu0 %vm166_vm0, %v70_v6  ;;  %v156_v6 = vld [vmem:[%s4709_s1 + $0x3b0] sm:$0xff] }
  0x7f   :  { %2693 = vmatpush3.xpose.msk.msra.mxu1 %vm166_vm0, %v86_v7  ;;  %2697 = vmatprep.subr.mxu0 %v3271_v2  ;;  %v139_v7 = vld [vmem:[%s4709_s1 + $0x328] sm:$0xff] }
  0x80   :  { %2732 = vmatprep.subr.mxu1 %v3271_v2 }
  0x81   :  { %2660 = vmatmul.mubr.msk.f32.vlgmr.msra.gmra.mxu0 %vm166_vm0, %v32_v8  ;;  %v155_v8 = vld [vmem:[%s4709_s1 + $0x3a8] sm:$0xff] }
  0x82   :  { %2695 = vmatmul.mubr.msk.f32.vlgmr.msra.gmra.mxu1 %vm166_vm0, %v33_v9  ;;  %2698 = vmatpush3.xpose.msk.msra.mxu0 %vm166_vm0, %v117_v11  ;;  %v138_v9 = vld [vmem:[%s4709_s1 + $0x320] sm:$0xff]  ;;  %v137_v11 = vld [vmem:[%s4709_s1 + $0x318] sm:$0xff] }
  0x83   :  { %2733 = vmatpush3.xpose.msk.msra.mxu1 %vm166_vm0, %v133_v12  ;;  %2699 = vmatprep.subr.mxu0 %v3271_v2  ;;  %v153_v12 = vld [vmem:[%s4709_s1 + $0x398] sm:$0xff] }
  0x84   :  { %2734 = vmatprep.subr.mxu1 %v3271_v2  ;;  %2729 = vmatprep.mubr.msk.f32.mxu0 %vm3272_vm1, %v3271_v2 }
  0x85   :  { %2764 = vmatprep.mubr.msk.f32.mxu1 %vm3272_vm1, %v3271_v2 }
  0x86   :  { %2700 = vmatpush3.xpose.msk.msra.mxu0 %vm166_vm0, %v116_v15  ;;  %v136_v15 = vld [vmem:[%s4709_s1 + $0x310] sm:$0xff] }
  0x87   :  { %2735 = vmatpush3.xpose.msk.msra.mxu1 %vm166_vm0, %v132_v16  ;;  %2701 = vmatprep.subr.mxu0 %v3271_v2  ;;  %v152_v16 = vld [vmem:[%s4709_s1 + $0x390] sm:$0xff] }
  0x88   :  { %2736 = vmatprep.subr.mxu1 %v3271_v2 }
  0x8a   :  { %2702 = vmatpush3.xpose.msk.msra.mxu0 %vm166_vm0, %v115_v18  ;;  %v135_v18 = vld [vmem:[%s4709_s1 + $0x308] sm:$0xff] }
  0x8b   :  { %2737 = vmatpush3.xpose.msk.msra.mxu1 %vm166_vm0, %v131_v19  ;;  %2703 = vmatprep.subr.mxu0 %v3271_v2  ;;  %v151_v19 = vld [vmem:[%s4709_s1 + $0x388] sm:$0xff] }
  0x8c   :  { %2738 = vmatprep.subr.mxu1 %v3271_v2 }
  0x8e   :  { %2704 = vmatpush3.xpose.msk.msra.mxu0 %vm166_vm0, %v114_v20  ;;  %v28_v20 = vld [vmem:[%s4708_s0 + $0x30] sm:$0xff] }
  0x8f   :  { %2739 = vmatpush3.xpose.msk.msra.mxu1 %vm166_vm0, %v130_v21  ;;  %2705 = vmatprep.subr.mxu0 %v3271_v2  ;;  %v29_v21 = vld [vmem:[%s4708_s0 + $0x38] sm:$0xff] }
  0x90   :  { %2740 = vmatprep.subr.mxu1 %v3271_v2 }
  0x92   :  { %2706 = vmatpush3.xpose.msk.msra.mxu0 %vm166_vm0, %v113_v22  ;;  %v134_v22 = vld [vmem:[%s4709_s1 + $0x300] sm:$0xff] }
  0x93   :  { %2741 = vmatpush3.xpose.msk.msra.mxu1 %vm166_vm0, %v129_v23  ;;  %2707 = vmatprep.subr.mxu0 %v3271_v2  ;;  %v150_v23 = vld [vmem:[%s4709_s1 + $0x380] sm:$0xff] }
  0x94   :  { %2742 = vmatprep.subr.mxu1 %v3271_v2 }
  0x96   :  { %2708 = vmatpush3.xpose.msk.msra.mxu0 %vm166_vm0, %v112_v24  ;;  %v36_v24 = vmul.f32 0.17677669, %v28_v20  ;;  %v1246_v20 = vld [vmem:[%s4710_s2 + $0x98] sm:$0xff] }
  0x97   :  { %2743 = vmatpush3.xpose.msk.msra.mxu1 %vm166_vm0, %v128_v25  ;;  %2709 = vmatprep.subr.mxu0 %v3271_v2  ;;  %v37_v25 = vmul.f32 0.17677669, %v29_v21  ;;  %v1227_v21 = vld [vmem:[%s4710_s2] sm:$0xff] }
  0x98   :  { %2744 = vmatprep.subr.mxu1 %v3271_v2 }
  0x9a   :  { %2710 = vmatpush3.xpose.msk.msra.mxu0 %vm166_vm0, %v111_v26 }
  0x9b   :  { %2745 = vmatpush3.xpose.msk.msra.mxu1 %vm166_vm0, %v127_v27  ;;  %2711 = vmatprep.subr.mxu0 %v3271_v2 }
  0x9c   :  { %2746 = vmatprep.subr.mxu1 %v3271_v2 }
  0x9e   :  { %2712 = vmatpush3.xpose.msk.msra.mxu0 %vm166_vm0, %v110_v28 }
  0x9f   :  { %2747 = vmatpush3.xpose.msk.msra.mxu1 %vm166_vm0, %v126_v29  ;;  %2713 = vmatprep.subr.mxu0 %v3271_v2 }
  0xa0   :  { %2748 = vmatprep.subr.mxu1 %v3271_v2 }
  0xa2   :  { %2714 = vmatpush3.xpose.msk.msra.mxu0 %vm166_vm0, %v109_v30 }
  0xa3   :  { %2749 = vmatpush3.xpose.msk.msra.mxu1 %vm166_vm0, %v125_v31  ;;  %2715 = vmatprep.subr.mxu0 %v3271_v2 }
  0xa4   :  { %2750 = vmatprep.subr.mxu1 %v3271_v2 }
  0xa6   :  { %2716 = vmatpush3.xpose.msk.msra.mxu0 %vm166_vm0, %v108_v32 }
  0xa7   :  { %2751 = vmatpush3.xpose.msk.msra.mxu1 %vm166_vm0, %v124_v33  ;;  %2717 = vmatprep.subr.mxu0 %v3271_v2 }
  0xa8   :  { %2752 = vmatprep.subr.mxu1 %v3271_v2 }
  0xaa   :  { %2718 = vmatpush3.xpose.msk.msra.mxu0 %vm166_vm0, %v107_v34 }
  0xab   :  { %2753 = vmatpush3.xpose.msk.msra.mxu1 %vm166_vm0, %v123_v35  ;;  %2719 = vmatprep.subr.mxu0 %v3271_v2 }
  0xac   :  { %2754 = vmatprep.subr.mxu1 %v3271_v2 }
  0xae   :  { %2720 = vmatpush3.xpose.msk.msra.mxu0 %vm166_vm0, %v106_v36 }
  0xaf   :  { %2755 = vmatpush3.xpose.msk.msra.mxu1 %vm166_vm0, %v122_v37  ;;  %2721 = vmatprep.subr.mxu0 %v3271_v2 }
  0xb0   :  { %2756 = vmatprep.subr.mxu1 %v3271_v2 }
  0xb2   :  { %2722 = vmatpush3.xpose.msk.msra.mxu0 %vm166_vm0, %v105_v38 }
  0xb3   :  { %2757 = vmatpush3.xpose.msk.msra.mxu1 %vm166_vm0, %v121_v39  ;;  %2723 = vmatprep.subr.mxu0 %v3271_v2 }
  0xb4   :  { %2758 = vmatprep.subr.mxu1 %v3271_v2 }
  0xb6   :  { %2724 = vmatpush3.xpose.msk.msra.mxu0 %vm166_vm0, %v104_v40 }
  0xb7   :  { %2759 = vmatpush3.xpose.msk.msra.mxu1 %vm166_vm0, %v120_v41  ;;  %2725 = vmatprep.subr.mxu0 %v3271_v2 }
  0xb8   :  { %2760 = vmatprep.subr.mxu1 %v3271_v2 }
  0xba   :  { %2726 = vmatpush3.xpose.msk.msra.mxu0 %vm166_vm0, %v103_v42 }
  0xbb   :  { %2761 = vmatpush3.xpose.msk.msra.mxu1 %vm166_vm0, %v119_v43  ;;  %2727 = vmatprep.subr.mxu0 %v3271_v2 }
  0xbc   :  { %2762 = vmatprep.subr.mxu1 %v3271_v2 }
  0xbe   :  { %2728 = vmatpush3.xpose.msk.msra.mxu0 %vm166_vm0, %v102_v46 }
  0xbf   :  { %2763 = vmatpush3.xpose.msk.msra.mxu1 %vm166_vm0, %v118_v47  ;;  %2767 = vmatprep.subr.mxu0 %v3271_v2 }
  0xc0   :  { %2802 = vmatprep.subr.mxu1 %v3271_v2 }
  0xc1   :  { %2730 = vmatmul.mubr.msk.f32.vlgmr.msra.gmra.mxu0 %vm166_vm0, %v34_v48 }
  0xc2   :  { %2765 = vmatmul.mubr.msk.f32.vlgmr.msra.gmra.mxu1 %vm166_vm0, %v35_v49  ;;  %2768 = vmatpush3.xpose.msk.msra.mxu0 %vm166_vm0, %v149_v50  ;;  %v1242_v50 = vld [vmem:[%s4710_s2 + $0x78] sm:$0xff] }
  0xc3   :  { %2803 = vmatpush3.xpose.msk.msra.mxu1 %vm166_vm0, %v165_v51  ;;  %2769 = vmatprep.subr.mxu0 %v3271_v2  ;;  %v1241_v51 = vld [vmem:[%s4710_s2 + $0x70] sm:$0xff] }
  0xc4   :  { %2804 = vmatprep.subr.mxu1 %v3271_v2  ;;  %2799 = vmatprep.mubr.msk.f32.mxu0 %vm3272_vm1, %v3271_v2 }
  0xc5   :  { %2834 = vmatprep.mubr.msk.f32.mxu1 %vm3272_vm1, %v3271_v2 }
  0xc6   :  { %2770 = vmatpush3.xpose.msk.msra.mxu0 %vm166_vm0, %v148_v52 }
  0xc7   :  { %2805 = vmatpush3.xpose.msk.msra.mxu1 %vm166_vm0, %v164_v53  ;;  %2771 = vmatprep.subr.mxu0 %v3271_v2  ;;  %v1258_v53 = vld [vmem:[%s4710_s2 + $0xf8] sm:$0xff] }
  0xc8   :  { %2806 = vmatprep.subr.mxu1 %v3271_v2 }
  0xca   :  { %2772 = vmatpush3.xpose.msk.msra.mxu0 %vm166_vm0, %v147_v54  ;;  %v1240_v54 = vld [vmem:[%s4710_s2 + $0x68] sm:$0xff] }
  0xcb   :  { %2807 = vmatpush3.xpose.msk.msra.mxu1 %vm166_vm0, %v163_v55  ;;  %2773 = vmatprep.subr.mxu0 %v3271_v2 }
  0xcc   :  { %2808 = vmatprep.subr.mxu1 %v3271_v2 }
  0xce   :  { %2774 = vmatpush3.xpose.msk.msra.mxu0 %vm166_vm0, %v146_v56  ;;  %v1239_v56 = vld [vmem:[%s4710_s2 + $0x60] sm:$0xff] }
  0xcf   :  { %2809 = vmatpush3.xpose.msk.msra.mxu1 %vm166_vm0, %v162_v57  ;;  %2775 = vmatprep.subr.mxu0 %v3271_v2  ;;  %v1257_v57 = vld [vmem:[%s4710_s2 + $0xf0] sm:$0xff] }
  0xd0   :  { %2810 = vmatprep.subr.mxu1 %v3271_v2 }
  0xd2   :  { %2776 = vmatpush3.xpose.msk.msra.mxu0 %vm166_vm0, %v145_v58  ;;  %v1238_v58 = vld [vmem:[%s4710_s2 + $0x58] sm:$0xff] }
  0xd3   :  { %2811 = vmatpush3.xpose.msk.msra.mxu1 %vm166_vm0, %v161_v59  ;;  %2777 = vmatprep.subr.mxu0 %v3271_v2  ;;  %v1256_v59 = vld [vmem:[%s4710_s2 + $0xe8] sm:$0xff] }
  0xd4   :  { %2812 = vmatprep.subr.mxu1 %v3271_v2 }
  0xd6   :  { %2778 = vmatpush3.xpose.msk.msra.mxu0 %vm166_vm0, %v144_v60 }
  0xd7   :  { %2813 = vmatpush3.xpose.msk.msra.mxu1 %vm166_vm0, %v160_v61  ;;  %2779 = vmatprep.subr.mxu0 %v3271_v2  ;;  %v1237_v61 = vld [vmem:[%s4710_s2 + $0x50] sm:$0xff] }
  0xd8   :  { %2814 = vmatprep.subr.mxu1 %v3271_v2 }
  0xda   :  { %2780 = vmatpush3.xpose.msk.msra.mxu0 %vm166_vm0, %v143_v62  ;;  %v1255_v62 = vld [vmem:[%s4710_s2 + $0xe0] sm:$0xff] }
  0xdb   :  { %2815 = vmatpush3.xpose.msk.msra.mxu1 %vm166_vm0, %v159_v63  ;;  %2781 = vmatprep.subr.mxu0 %v3271_v2  ;;  %v1236_v63 = vld [vmem:[%s4710_s2 + $0x48] sm:$0xff] }
  0xdc   :  { %2816 = vmatprep.subr.mxu1 %v3271_v2 }
  0xde   :  { %2782 = vmatpush3.xpose.msk.msra.mxu0 %vm166_vm0, %v142_v0  ;;  %v1254_v0 = vld [vmem:[%s4710_s2 + $0xd8] sm:$0xff] }
  0xdf   :  { %2817 = vmatpush3.xpose.msk.msra.mxu1 %vm166_vm0, %v158_v1  ;;  %2783 = vmatprep.subr.mxu0 %v3271_v2  ;;  %v1235_v1 = vld [vmem:[%s4710_s2 + $0x40] sm:$0xff] }
  0xe0   :  { %2818 = vmatprep.subr.mxu1 %v3271_v2 }
  0xe2   :  { %2784 = vmatpush3.xpose.msk.msra.mxu0 %vm166_vm0, %v141_v3  ;;  %v1253_v3 = vld [vmem:[%s4710_s2 + $0xd0] sm:$0xff] }
  0xe3   :  { %2819 = vmatpush3.xpose.msk.msra.mxu1 %vm166_vm0, %v157_v4  ;;  %2785 = vmatprep.subr.mxu0 %v3271_v2  ;;  %v1234_v4 = vld [vmem:[%s4710_s2 + $0x38] sm:$0xff] }
  0xe4   :  { %2820 = vmatprep.subr.mxu1 %v3271_v2 }
  0xe6   :  { %2786 = vmatpush3.xpose.msk.msra.mxu0 %vm166_vm0, %v140_v5  ;;  %v1252_v5 = vld [vmem:[%s4710_s2 + $0xc8] sm:$0xff] }
  0xe7   :  { %2821 = vmatpush3.xpose.msk.msra.mxu1 %vm166_vm0, %v156_v6  ;;  %2787 = vmatprep.subr.mxu0 %v3271_v2  ;;  %v1233_v6 = vld [vmem:[%s4710_s2 + $0x30] sm:$0xff] }
  0xe8   :  { %2822 = vmatprep.subr.mxu1 %v3271_v2 }
  0xea   :  { %2788 = vmatpush3.xpose.msk.msra.mxu0 %vm166_vm0, %v139_v7  ;;  %v1251_v7 = vld [vmem:[%s4710_s2 + $0xc0] sm:$0xff] }
  0xeb   :  { %2823 = vmatpush3.xpose.msk.msra.mxu1 %vm166_vm0, %v155_v8  ;;  %2789 = vmatprep.subr.mxu0 %v3271_v2  ;;  %v1232_v8 = vld [vmem:[%s4710_s2 + $0x28] sm:$0xff] }
  0xec   :  { %2824 = vmatprep.subr.mxu1 %v3271_v2 }
  0xee   :  { %2790 = vmatpush3.xpose.msk.msra.mxu0 %vm166_vm0, %v138_v9  ;;  %v1250_v9 = vld [vmem:[%s4710_s2 + $0xb8] sm:$0xff] }
  0xef   :  { %2825 = vmatpush3.xpose.msk.msra.mxu1 %vm166_vm0, %v154_v10  ;;  %2791 = vmatprep.subr.mxu0 %v3271_v2  ;;  %v1231_v10 = vld [vmem:[%s4710_s2 + $0x20] sm:$0xff] }
  0xf0   :  { %2826 = vmatprep.subr.mxu1 %v3271_v2 }
  0xf2   :  { %2792 = vmatpush3.xpose.msk.msra.mxu0 %vm166_vm0, %v137_v11  ;;  %v1249_v11 = vld [vmem:[%s4710_s2 + $0xb0] sm:$0xff] }
  0xf3   :  { %2827 = vmatpush3.xpose.msk.msra.mxu1 %vm166_vm0, %v153_v12  ;;  %2793 = vmatprep.subr.mxu0 %v3271_v2  ;;  %v1230_v12 = vld [vmem:[%s4710_s2 + $0x18] sm:$0xff] }
  0xf4   :  { %2828 = vmatprep.subr.mxu1 %v3271_v2 }
  0xf6   :  { %2794 = vmatpush3.xpose.msk.msra.mxu0 %vm166_vm0, %v136_v15  ;;  %v1248_v15 = vld [vmem:[%s4710_s2 + $0xa8] sm:$0xff] }
  0xf7   :  { %2829 = vmatpush3.xpose.msk.msra.mxu1 %vm166_vm0, %v152_v16  ;;  %2795 = vmatprep.subr.mxu0 %v3271_v2  ;;  %v1229_v16 = vld [vmem:[%s4710_s2 + $0x10] sm:$0xff] }
  0xf8   :  { %2830 = vmatprep.subr.mxu1 %v3271_v2 }
  0xfa   :  { %2796 = vmatpush3.xpose.msk.msra.mxu0 %vm166_vm0, %v135_v18  ;;  %v1247_v18 = vld [vmem:[%s4710_s2 + $0xa0] sm:$0xff] }
  0xfb   :  { %2831 = vmatpush3.xpose.msk.msra.mxu1 %vm166_vm0, %v151_v19  ;;  %2797 = vmatprep.subr.mxu0 %v3271_v2  ;;  %v1228_v19 = vld [vmem:[%s4710_s2 + $0x8] sm:$0xff] }
  0xfc   :  { %2832 = vmatprep.subr.mxu1 %v3271_v2 }
  0xfe   :  { %2798 = vmatpush3.xpose.msk.msra.mxu0 %vm166_vm0, %v134_v22  ;;  %v1245_v22 = vld [vmem:[%s4710_s2 + $0x90] sm:$0xff] }
  0xff   :  { %2833 = vmatpush3.xpose.msk.msra.mxu1 %vm166_vm0, %v150_v23  ;;  %2837 = vmatprep.subr.mxu0 %v3271_v2  ;;  %v1244_v23 = vld [vmem:[%s4710_s2 + $0x88] sm:$0xff] }
 0x100   :  { %2872 = vmatprep.subr.mxu1 %v3271_v2 }
 0x101   :  { %v284_v27 = vpop.f32.mrf.mxu0  ;;  %2800 = vmatmul.mubr.msk.f32.vlgmr.msra.gmra.mxu0 %vm166_vm0, %v36_v24  ;;  %v1243_v24 = vld [vmem:[%s4710_s2 + $0x80] sm:$0xff] }
 0x102   :  { %v405_v28 = vpop.f32.mrf.mxu1  ;;  %2835 = vmatmul.mubr.msk.f32.vlgmr.msra.gmra.mxu1 %vm166_vm0, %v37_v25  ;;  %v1147_v29 = vsel %vm4009_vm4, -inf, %v284_v27  ;;  %2869 = vmatprep.mubr.msk.f32.mxu0 %vm3272_vm1, %v3271_v2 }
 0x103   :  { %2904 = vmatprep.mubr.msk.f32.mxu1 %vm3272_vm1, %v3271_v2  ;;  %1155 = vmax.xlane.f32.xlu0 %v1147_v29  ;;  %v2591_v31 = vpop.f32.mrf.mxu0  ;;  %v1148_v32 = vsel %vm4009_vm4, -inf, %v405_v28 }
 0x104   :  { %v2626_v30 = vpop.f32.mrf.mxu1  ;;  %2838 = vmatpush3.msra.mxu0 %v1242_v50  ;;  %2873 = vmatpush3.msra.mxu1 %v1258_v53 }
 0x105   :  { %2839 = vmatprep.subr.mxu0 %v3271_v2  ;;  %2874 = vmatprep.subr.mxu1 %v3271_v2 }
 0x106   :  { %2840 = vmatpush3.msra.mxu0 %v1241_v51  ;;  %2875 = vmatpush3.msra.mxu1 %v1257_v57  ;;  %v1271_v57 = vld [vmem:[%s4710_s2 + $0x160] sm:$0xff] }
 0x107   :  { %1157 = vmax.xlane.f32.xlu0 %v1148_v32  ;;  %2841 = vmatprep.subr.mxu0 %v3271_v2 }
 0x108   :  { %2842 = vmatpush3.msra.mxu0 %v1240_v54  ;;  %2876 = vmatprep.subr.mxu1 %v3271_v2 }
 0x109   :  { %2843 = vmatprep.subr.mxu0 %v3271_v2  ;;  %2877 = vmatpush3.msra.mxu1 %v1256_v59  ;;  %v1270_v59 = vld [vmem:[%s4710_s2 + $0x158] sm:$0xff] }
 0x10a   :  { %2844 = vmatpush3.msra.mxu0 %v1239_v56  ;;  %2878 = vmatprep.subr.mxu1 %v3271_v2  ;;  %v1290_v56 = vld [vmem:[%s4710_s2 + $0x1f8] sm:$0xff] }
 0x10b   :  { %2845 = vmatprep.subr.mxu0 %v3271_v2  ;;  %2879 = vmatpush3.msra.mxu1 %v1255_v62  ;;  %v1287_v62 = vld [vmem:[%s4710_s2 + $0x1e0] sm:$0xff] }
 0x10c   :  { %2846 = vmatpush3.msra.mxu0 %v1238_v58  ;;  %2880 = vmatprep.subr.mxu1 %v3271_v2  ;;  %v1289_v58 = vld [vmem:[%s4710_s2 + $0x1f0] sm:$0xff] }
 0x10d   :  { %2847 = vmatprep.subr.mxu0 %v3271_v2  ;;  %2881 = vmatpush3.msra.mxu1 %v1254_v0  ;;  %v1286_v0 = vld [vmem:[%s4710_s2 + $0x1d8] sm:$0xff] }
 0x10e   :  { %2848 = vmatpush3.msra.mxu0 %v1237_v61  ;;  %2882 = vmatprep.subr.mxu1 %v3271_v2  ;;  %v1269_v61 = vld [vmem:[%s4710_s2 + $0x150] sm:$0xff] }
 0x10f   :  { %2849 = vmatprep.subr.mxu0 %v3271_v2  ;;  %2883 = vmatpush3.msra.mxu1 %v1253_v3  ;;  %v1285_v3 = vld [vmem:[%s4710_s2 + $0x1d0] sm:$0xff] }
 0x110   :  { %2850 = vmatpush3.msra.mxu0 %v1236_v63  ;;  %2884 = vmatprep.subr.mxu1 %v3271_v2  ;;  %v1268_v63 = vld [vmem:[%s4710_s2 + $0x148] sm:$0xff] }
 0x111   :  { %2851 = vmatprep.subr.mxu0 %v3271_v2  ;;  %2885 = vmatpush3.msra.mxu1 %v1252_v5  ;;  %v1284_v5 = vld [vmem:[%s4710_s2 + $0x1c8] sm:$0xff] }
 0x112   :  { %2852 = vmatpush3.msra.mxu0 %v1235_v1  ;;  %2886 = vmatprep.subr.mxu1 %v3271_v2  ;;  %v1267_v1 = vld [vmem:[%s4710_s2 + $0x140] sm:$0xff] }
 0x113   :  { %2853 = vmatprep.subr.mxu0 %v3271_v2  ;;  %2887 = vmatpush3.msra.mxu1 %v1251_v7  ;;  %v1265_v7 = vld [vmem:[%s4710_s2 + $0x130] sm:$0xff] }
 0x114   :  { %2854 = vmatpush3.msra.mxu0 %v1234_v4  ;;  %2888 = vmatprep.subr.mxu1 %v3271_v2  ;;  %v1266_v4 = vld [vmem:[%s4710_s2 + $0x138] sm:$0xff] }
 0x115   :  { %2855 = vmatprep.subr.mxu0 %v3271_v2  ;;  %2889 = vmatpush3.msra.mxu1 %v1250_v9  ;;  %v1282_v9 = vld [vmem:[%s4710_s2 + $0x1b8] sm:$0xff] }
 0x116   :  { %2856 = vmatpush3.msra.mxu0 %v1233_v6  ;;  %2890 = vmatprep.subr.mxu1 %v3271_v2  ;;  %v1283_v6 = vld [vmem:[%s4710_s2 + $0x1c0] sm:$0xff] }
 0x117   :  { %2857 = vmatprep.subr.mxu0 %v3271_v2  ;;  %2891 = vmatpush3.msra.mxu1 %v1249_v11 }
 0x118   :  { %2858 = vmatpush3.msra.mxu0 %v1232_v8  ;;  %2892 = vmatprep.subr.mxu1 %v3271_v2  ;;  %v1264_v8 = vld [vmem:[%s4710_s2 + $0x128] sm:$0xff] }
 0x119   :  { %2859 = vmatprep.subr.mxu0 %v3271_v2  ;;  %2893 = vmatpush3.msra.mxu1 %v1248_v15 }
 0x11a   :  { %2860 = vmatpush3.msra.mxu0 %v1231_v10  ;;  %2894 = vmatprep.subr.mxu1 %v3271_v2 }
 0x11b   :  { %2861 = vmatprep.subr.mxu0 %v3271_v2  ;;  %2895 = vmatpush3.msra.mxu1 %v1247_v18  ;;  %v1281_v18 = vld [vmem:[%s4710_s2 + $0x1b0] sm:$0xff] }
 0x11c   :  { %2862 = vmatpush3.msra.mxu0 %v1230_v12  ;;  %2896 = vmatprep.subr.mxu1 %v3271_v2 }
 0x11d   :  { %2863 = vmatprep.subr.mxu0 %v3271_v2  ;;  %2897 = vmatpush3.msra.mxu1 %v1246_v20 }
 0x11e   :  { %2864 = vmatpush3.msra.mxu0 %v1229_v16  ;;  %2898 = vmatprep.subr.mxu1 %v3271_v2  ;;  %v1263_v16 = vld [vmem:[%s4710_s2 + $0x120] sm:$0xff] }
 0x11f   :  { %2865 = vmatprep.subr.mxu0 %v3271_v2  ;;  %2899 = vmatpush3.msra.mxu1 %v1245_v22  ;;  %v1280_v22 = vld [vmem:[%s4710_s2 + $0x1a8] sm:$0xff] }
 0x120   :  { %2866 = vmatpush3.msra.mxu0 %v1228_v19  ;;  %2900 = vmatprep.subr.mxu1 %v3271_v2 }
 0x121   :  { %2867 = vmatprep.subr.mxu0 %v3271_v2  ;;  %2901 = vmatpush3.msra.mxu1 %v1244_v23  ;;  %v1261_v23 = vld [vmem:[%s4710_s2 + $0x110] sm:$0xff] }
 0x122   :  { %2868 = vmatpush3.msra.mxu0 %v1227_v21  ;;  %2902 = vmatprep.subr.mxu1 %v3271_v2  ;;  %v1262_v21 = vld [vmem:[%s4710_s2 + $0x118] sm:$0xff] }
 0x123   :  { %2907 = vmatprep.subr.mxu0 %v3271_v2  ;;  %2903 = vmatpush3.msra.mxu1 %v1243_v24  ;;  %v1279_v24 = vld [vmem:[%s4710_s2 + $0x1a0] sm:$0xff] }
 0x124   :  { %2942 = vmatprep.subr.mxu1 %v3271_v2 }
 0x141   :  { %v526_v33 = vpop.f32.mrf.mxu0 }
 0x142   :  { %v647_v34 = vpop.f32.mrf.mxu1  ;;  %v4027_v35 = vsel %vm4009_vm4, -inf, %v526_v33 }
 0x143   :  { %1159 = vmax.xlane.f32.xlu1 %v4027_v35  ;;  %v2661_v37 = vpop.f32.mrf.mxu0  ;;  %v4032_v38 = vsel %vm4009_vm4, -inf, %v647_v34 }
 0x144   :  { %v2696_v36 = vpop.f32.mrf.mxu1 }
 0x147   :  { %1161 = vmax.xlane.f32.xlu1 %v4032_v38 }
 0x181   :  { %v768_v39 = vpop.f32.mrf.mxu0 }
 0x182   :  { %v889_v40 = vpop.f32.mrf.mxu1  ;;  %v4041_v42 = vsel %vm4009_vm4, -inf, %v768_v39 }
 0x183   :  { %v4037_v41 = vsel %vm4009_vm4, -inf, %v889_v40  ;;  %1163 = vmax.xlane.f32.xlu0 %v4041_v42  ;;  %v2731_v44 = vpop.f32.mrf.mxu0 }
 0x184   :  { %v2766_v43 = vpop.f32.mrf.mxu1  ;;  %1165 = vmax.xlane.f32.xlu1 %v4037_v41 }
 0x18c   :  { %v1156_v45 = vpop.xlane.xlu0 %1155 }
 0x18d   :  { %v1171_v46 = vsub.f32 %v1147_v29, %v1156_v45 }
 0x18f   :  { %v1179_v47 = vmul.f32 1.442695, %v1171_v46 }
 0x190   :  { %v1158_v48 = vpop.xlane.xlu0 %1157 }
 0x191   :  { %3127 = vpow2.f32 %v1179_v47  ;;  %v1172_v49 = vsub.f32 %v1148_v32, %v1158_v48 }
 0x193   :  { %v1181_v52 = vmul.f32 1.442695, %v1172_v49 }
 0x195   :  { %3129 = vpow2.f32 %v1181_v52  ;;  %v1273_v52 = vld [vmem:[%s4710_s2 + $0x170] sm:$0xff] }
 0x19e   :  { %v4061_v55 = vpop.eup %3127 }
 0x19f   :  { %1195 = vadd.xlane.f32.xlu0 %v4061_v55 }
 0x1a2   :  { %v4076_v60 = vpop.eup %3129 }
 0x1a3   :  { %1197 = vadd.xlane.f32.xlu1 %v4076_v60 }
 0x1c1   :  { %v1010_v25 = vpop.f32.mrf.mxu0 }
 0x1c2   :  { %v1131_v27 = vpop.f32.mrf.mxu1  ;;  %v4185_v29 = vsel %vm4009_vm4, -inf, %v1010_v25  ;;  %v1260_v25 = vld [vmem:[%s4710_s2 + $0x108] sm:$0xff] }
 0x1c3   :  { %v4181_v28 = vsel %vm4009_vm4, -inf, %v1131_v27  ;;  %1167 = vmax.xlane.f32.xlu0 %v4185_v29  ;;  %v2801_v31 = vpop.f32.mrf.mxu0  ;;  %v1278_v27 = vld [vmem:[%s4710_s2 + $0x198] sm:$0xff] }
 0x1c4   :  { %v2836_v30 = vpop.f32.mrf.mxu1  ;;  %1169 = vmax.xlane.f32.xlu1 %v4181_v28  ;;  %v4335_v31 = vld [vmem:[%s4711_s3 + $0x8] sm:$0xff] }
 0x1c5   :  { %v1276_v30 = vld [vmem:[%s4710_s2 + $0x188] sm:$0xff] }
 0x1cc   :  { %v1160_v32 = vpop.xlane.xlu1 %1159 }
 0x1cd   :  { %v1173_v33 = vsub.f32 %v4027_v35, %v1160_v32  ;;  %v1275_v32 = vld [vmem:[%s4710_s2 + $0x180] sm:$0xff] }
 0x1cf   :  { %v1183_v34 = vmul.f32 1.442695, %v1173_v33  ;;  %v1940_v33 = vmul.f32 %v4335_v31, %v4335_v31 }
 0x1d0   :  { %v1162_v36 = vpop.xlane.xlu1 %1161 }
 0x1d1   :  { %3131 = vpow2.f32 %v1183_v34  ;;  %v1174_v37 = vsub.f32 %v4032_v38, %v1162_v36  ;;  %v4350_v34 = vld [vmem:[%s4711_s3 + $0x10] sm:$0xff] }
 0x1d2   :  { %v1941_v36 = vmul.f32 %v4350_v34, %v4350_v34 }
 0x1d3   :  { %v1185_v39 = vmul.f32 1.442695, %v1174_v37 }
 0x1d5   :  { %3133 = vpow2.f32 %v1185_v39 }
 0x1de   :  { %v4191_v40 = vpop.eup %3131 }
 0x1df   :  { %1199 = vadd.xlane.f32.xlu0 %v4191_v40 }
 0x1e2   :  { %v4194_v26 = vpop.eup %3133 }
 0x1e3   :  { %1201 = vadd.xlane.f32.xlu1 %v4194_v26 }
 0x20c   :  { %v1164_v44 = vpop.xlane.xlu0 %1163 }
 0x20d   :  { %v1166_v43 = vpop.xlane.xlu1 %1165  ;;  %v1175_v35 = vsub.f32 %v4041_v42, %v1164_v44  ;;  %v1274_v42 = vld [vmem:[%s4710_s2 + $0x178] sm:$0xff] }
 0x20e   :  { %v1176_v45 = vsub.f32 %v4037_v41, %v1166_v43  ;;  %v4364_v43 = vld [vmem:[%s4711_s3 + $0x18] sm:$0xff] }
 0x20f   :  { %v1187_v47 = vmul.f32 1.442695, %v1175_v35  ;;  %v1942_v44 = vmul.f32 %v4364_v43, %v4364_v43 }
 0x210   :  { %v1189_v46 = vmul.f32 1.442695, %v1176_v45  ;;  %v4371_v45 = vld [vmem:[%s4711_s3 + $0x20] sm:$0xff] }
 0x211   :  { %v1943_v35 = vmul.f32 %v4371_v45, %v4371_v45 }
 0x212   :  { %3135 = vpow2.f32 %v1189_v46 }
 0x213   :  { %3137 = vpow2.f32 %v1187_v47 }
 0x21f   :  { %v4199_v38 = vpop.eup %3135 }
 0x220   :  { %v4201_v48 = vpop.eup %3137  ;;  %1205 = vadd.xlane.f32.xlu1 %v4199_v38 }
 0x221   :  { %1203 = vadd.xlane.f32.xlu0 %v4201_v48 }
 0x228   :  { %v1196_v49 = vpop.xlane.xlu0 %1195 }
 0x229   :  { %3139 = vrcp.f32 %v1196_v49  ;;  %v3273_v49 = vmov 0  }
 0x22a   :  { %3126 = vset.pattern.permute.xlu1 %v3273_v49  ;;  %3125 = vset.pattern.permute.xlu0 %v3273_v49 }
 0x22c   :  { %v1198_v50 = vpop.xlane.xlu1 %1197 }
 0x22d   :  { %3141 = vrcp.f32 %v1198_v50 }
 0x236   :  { %v3140_v51 = vpop.eup %3139 }
 0x237   :  { %v1219_v41 = vmul.f32 %v3140_v51, %v4061_v55  ;;  %v1272_v55 = vld [vmem:[%s4710_s2 + $0x168] sm:$0xff] }
 0x239   :  { %2870 = vmatmul.mubr.f32.vlgmr.msra.gmra.mxu0 %v1219_v41  ;;  %2086 = vst [vmem:[#allocation4] sm:$0xff] %v1219_v41 }
 0x23a   :  { %v3142_v53 = vpop.eup %3141  ;;  %2908 = vmatpush3.msra.mxu0 %v1274_v42  ;;  %2939 = vmatprep.mubr.msk.f32.mxu0 %vm3272_vm1, %v3271_v2 }
 0x23b   :  { %v1220_v54 = vmul.f32 %v3142_v53, %v4076_v60  ;;  %2909 = vmatprep.subr.mxu0 %v3271_v2  ;;  %v1288_v60 = vld [vmem:[%s4710_s2 + $0x1e8] sm:$0xff] }
 0x23c   :  { %2910 = vmatpush3.msra.mxu0 %v1273_v52 }
 0x23d   :  { %2905 = vmatmul.mubr.f32.vlgmr.msra.gmra.mxu1 %v1220_v54  ;;  %2087 = vst [vmem:[#allocation4 + $0x8] sm:$0xff] %v1220_v54  ;;  %2911 = vmatprep.subr.mxu0 %v3271_v2 }
 0x23e   :  { %2912 = vmatpush3.msra.mxu0 %v1272_v55  ;;  %2943 = vmatpush3.msra.mxu1 %v1290_v56 }
 0x23f   :  { %2944 = vmatprep.subr.mxu1 %v3271_v2  ;;  %2913 = vmatprep.subr.mxu0 %v3271_v2 }
 0x240   :  { %2914 = vmatpush3.msra.mxu0 %v1271_v57  ;;  %2945 = vmatpush3.msra.mxu1 %v1289_v58  ;;  %v1306_v57 = vld [vmem:[%s4710_s2 + $0x278] sm:$0xff] }
 0x241   :  { %2915 = vmatprep.subr.mxu0 %v3271_v2  ;;  %2946 = vmatprep.subr.mxu1 %v3271_v2 }
 0x242   :  { %2916 = vmatpush3.msra.mxu0 %v1270_v59  ;;  %2947 = vmatpush3.msra.mxu1 %v1288_v60  ;;  %v1305_v59 = vld [vmem:[%s4710_s2 + $0x270] sm:$0xff] }
 0x243   :  { %2917 = vmatprep.subr.mxu0 %v3271_v2  ;;  %2948 = vmatprep.subr.mxu1 %v3271_v2 }
 0x244   :  { %2918 = vmatpush3.msra.mxu0 %v1269_v61  ;;  %2949 = vmatpush3.msra.mxu1 %v1287_v62  ;;  %v1304_v62 = vld [vmem:[%s4710_s2 + $0x268] sm:$0xff] }
 0x245   :  { %2919 = vmatprep.subr.mxu0 %v3271_v2  ;;  %2950 = vmatprep.subr.mxu1 %v3271_v2 }
 0x246   :  { %2920 = vmatpush3.msra.mxu0 %v1268_v63  ;;  %2951 = vmatpush3.msra.mxu1 %v1286_v0  ;;  %v1321_v63 = vld [vmem:[%s4710_s2 + $0x2f0] sm:$0xff]  ;;  %v1320_v0 = vld [vmem:[%s4710_s2 + $0x2e8] sm:$0xff] }
 0x247   :  { %2921 = vmatprep.subr.mxu0 %v3271_v2  ;;  %2952 = vmatprep.subr.mxu1 %v3271_v2 }
 0x248   :  { %2922 = vmatpush3.msra.mxu0 %v1267_v1  ;;  %2953 = vmatpush3.msra.mxu1 %v1285_v3  ;;  %v1302_v1 = vld [vmem:[%s4710_s2 + $0x258] sm:$0xff]  ;;  %v4410_v3 = vld [vmem:[%s4711_s3 + $0x28] sm:$0xff] }
 0x249   :  { %2923 = vmatprep.subr.mxu0 %v3271_v2  ;;  %2954 = vmatprep.subr.mxu1 %v3271_v2 }
 0x24a   :  { %2924 = vmatpush3.msra.mxu0 %v1266_v4  ;;  %2955 = vmatpush3.msra.mxu1 %v1284_v5  ;;  %v1319_v4 = vld [vmem:[%s4710_s2 + $0x2e0] sm:$0xff]  ;;  %v1301_v5 = vld [vmem:[%s4710_s2 + $0x250] sm:$0xff] }
 0x24b   :  { %2925 = vmatprep.subr.mxu0 %v3271_v2  ;;  %2956 = vmatprep.subr.mxu1 %v3271_v2 }
 0x24c   :  { %v1168_v11 = vpop.xlane.xlu0 %1167  ;;  %2957 = vmatpush3.msra.mxu1 %v1283_v6  ;;  %2926 = vmatpush3.msra.mxu0 %v1265_v7  ;;  %v4423_v6 = vld [vmem:[%s4711_s3] sm:$0xff]  ;;  %v1318_v7 = vld [vmem:[%s4710_s2 + $0x2d8] sm:$0xff] }
 0x24d   :  { %v1170_v10 = vpop.xlane.xlu1 %1169  ;;  %v1177_v15 = vsub.f32 %v4185_v29, %v1168_v11  ;;  %2927 = vmatprep.subr.mxu0 %v3271_v2  ;;  %2958 = vmatprep.subr.mxu1 %v3271_v2  ;;  %v1277_v29 = vld [vmem:[%s4710_s2 + $0x190] sm:$0xff]  ;;  %v1939_v11 = vmul.f32 %v4423_v6, %v4423_v6 }
 0x24e   :  { %v1178_v12 = vsub.f32 %v4181_v28, %v1170_v10  ;;  %2928 = vmatpush3.msra.mxu0 %v1264_v8  ;;  %2959 = vmatpush3.msra.mxu1 %v1282_v9  ;;  %v1259_v28 = vld [vmem:[%s4710_s2 + $0x100] sm:$0xff]  ;;  %v1300_v8 = vld [vmem:[%s4710_s2 + $0x248] sm:$0xff]  ;;  %v1944_v9 = vmul.f32 %v4410_v3, %v4410_v3  ;;  %v4438_v10 = vld [vmem:[%s4711_s3 + $0x30] sm:$0xff] }
 0x24f   :  { %v1191_v20 = vmul.f32 1.442695, %v1177_v15  ;;  %2929 = vmatprep.subr.mxu0 %v3271_v2  ;;  %2960 = vmatprep.subr.mxu1 %v3271_v2  ;;  %v1299_v15 = vld [vmem:[%s4710_s2 + $0x240] sm:$0xff] }
 0x250   :  { %v1193_v19 = vmul.f32 1.442695, %v1178_v12  ;;  %2930 = vmatpush3.msra.mxu0 %v1263_v16  ;;  %2961 = vmatpush3.msra.mxu1 %v1281_v18  ;;  %v1317_v12 = vld [vmem:[%s4710_s2 + $0x2d0] sm:$0xff]  ;;  %v1316_v16 = vld [vmem:[%s4710_s2 + $0x2c8] sm:$0xff]  ;;  %v1298_v18 = vld [vmem:[%s4710_s2 + $0x238] sm:$0xff] }
 0x251   :  { %2931 = vmatprep.subr.mxu0 %v3271_v2  ;;  %2962 = vmatprep.subr.mxu1 %v3271_v2 }
 0x252   :  { %3143 = vpow2.f32 %v1193_v19  ;;  %2932 = vmatpush3.msra.mxu0 %v1262_v21  ;;  %2963 = vmatpush3.msra.mxu1 %v1280_v22  ;;  %v1945_v19 = vmul.f32 %v4438_v10, %v4438_v10  ;;  %v1315_v21 = vld [vmem:[%s4710_s2 + $0x2c0] sm:$0xff]  ;;  %v1297_v22 = vld [vmem:[%s4710_s2 + $0x230] sm:$0xff] }
 0x253   :  { %3145 = vpow2.f32 %v1191_v20  ;;  %2933 = vmatprep.subr.mxu0 %v3271_v2  ;;  %2964 = vmatprep.subr.mxu1 %v3271_v2  ;;  %v4463_v20 = vld [vmem:[%s4711_s3 + $0x38] sm:$0xff] }
 0x254   :  { %2934 = vmatpush3.msra.mxu0 %v1261_v23  ;;  %2965 = vmatpush3.msra.mxu1 %v1279_v24  ;;  %3147 = vrcp.f32 %v1940_v33  ;;  %v1314_v23 = vld [vmem:[%s4710_s2 + $0x2b8] sm:$0xff]  ;;  %v1296_v24 = vld [vmem:[%s4710_s2 + $0x228] sm:$0xff]  ;;  %v1311_v33 = vld [vmem:[%s4710_s2 + $0x2a0] sm:$0xff] }
 0x255   :  { %2935 = vmatprep.subr.mxu0 %v3271_v2  ;;  %2966 = vmatprep.subr.mxu1 %v3271_v2  ;;  %3149 = vrcp.f32 %v1941_v36  ;;  %v1293_v36 = vld [vmem:[%s4710_s2 + $0x210] sm:$0xff] }
 0x256   :  { %2936 = vmatpush3.msra.mxu0 %v1260_v25  ;;  %2967 = vmatpush3.msra.mxu1 %v1278_v27  ;;  %3151 = vrcp.f32 %v1942_v44  ;;  %v1946_v25 = vmul.f32 %v4463_v20, %v4463_v20  ;;  %v1924_v27 = vmul.f32 2.5066283, %v4335_v31  ;;  %v1294_v31 = vld [vmem:[%s4710_s2 + $0x218] sm:$0xff]  ;;  %v1292_v44 = vld [vmem:[%s4710_s2 + $0x208] sm:$0xff] }
 0x257   :  { %2937 = vmatprep.subr.mxu0 %v3271_v2  ;;  %2968 = vmatprep.subr.mxu1 %v3271_v2  ;;  %3153 = vrcp.f32 %v1943_v35  ;;  %v1923_v35 = vmul.f32 2.5066283, %v4423_v6 }
 0x258   :  { %2938 = vmatpush3.msra.mxu0 %v1259_v28  ;;  %2969 = vmatpush3.msra.mxu1 %v1277_v29  ;;  %v1313_v28 = vld [vmem:[%s4710_s2 + $0x2b0] sm:$0xff]  ;;  %v1295_v29 = vld [vmem:[%s4710_s2 + $0x220] sm:$0xff] }
 0x259   :  { %2970 = vmatprep.subr.mxu1 %v3271_v2  ;;  %2974 = vmatprep.mubr.msk.f32.mxu1 %vm3272_vm1, %v3271_v2 }
 0x25a   :  { %2971 = vmatpush3.msra.mxu1 %v1276_v30  ;;  %2977 = vmatprep.subr.mxu0 %v3271_v2  ;;  %v1312_v30 = vld [vmem:[%s4710_s2 + $0x2a8] sm:$0xff] }
 0x25b   :  { %2972 = vmatprep.subr.mxu1 %v3271_v2 }
 0x25c   :  { %2973 = vmatpush3.msra.mxu1 %v1275_v32  ;;  %v1926_v32 = vmul.f32 2.5066283, %v4364_v43  ;;  %v1310_v43 = vld [vmem:[%s4710_s2 + $0x298] sm:$0xff] }
 0x25d   :  { %3012 = vmatprep.subr.mxu1 %v3271_v2 }
 0x25f   :  { %v4355_v37 = vpop.eup %3143 }
 0x260   :  { %v4357_v39 = vpop.eup %3145  ;;  %1209 = vadd.xlane.f32.xlu1 %v4355_v37 }
 0x261   :  { %1207 = vadd.xlane.f32.xlu0 %v4357_v39  ;;  %v3148_v47 = vpop.eup %3147 }
 0x262   :  { %v1956_v51 = vmul.f32 -0.5, %v3148_v47  ;;  %v3150_v41 = vpop.eup %3149  ;;  %v1928_v47 = vmul.f32 2.5066283, %v4410_v3 }
 0x263   :  { %v1957_v42 = vmul.f32 -0.5, %v3150_v41  ;;  %v3152_v52 = vpop.eup %3151  ;;  %v1308_v41 = vld [vmem:[%s4710_s2 + $0x288] sm:$0xff] }
 0x264   :  { %v1958_v53 = vmul.f32 -0.5, %v3152_v52  ;;  %v3154_v54 = vpop.eup %3153 }
 0x265   :  { %v1959_v58 = vmul.f32 -0.5, %v3154_v54 }
 0x268   :  { %v1200_v46 = vpop.xlane.xlu0 %1199 }
 0x269   :  { %3155 = vrcp.f32 %v1200_v46 }
 0x26c   :  { %v1202_v50 = vpop.xlane.xlu1 %1201 }
 0x26d   :  { %3157 = vrcp.f32 %v1202_v50  ;;  %v1309_v50 = vld [vmem:[%s4710_s2 + $0x290] sm:$0xff] }
 0x26e   :  { %3159 = vrcp.f32 %v1944_v9 }
 0x26f   :  { %3161 = vrcp.f32 %v1939_v11  ;;  %v1353_v11 = vld [vmem:[%s4710_s2 + $0x3f0] sm:$0xff] }
 0x270   :  { %3163 = vrcp.f32 %v1945_v19  ;;  %v1334_v19 = vld [vmem:[%s4710_s2 + $0x358] sm:$0xff] }
 0x271   :  { %1973 = vperm.xlu1 %3126, %v1956_v51   ;;  %3165 = vrcp.f32 %v1946_v25  ;;  %v1291_v51 = vld [vmem:[%s4710_s2 + $0x200] sm:$0xff] }
 0x272   :  { %3167 = vrcp.f32 %v1924_v27  ;;  %v1331_v25 = vld [vmem:[%s4710_s2 + $0x340] sm:$0xff]  ;;  %v1346_v27 = vld [vmem:[%s4710_s2 + $0x3b8] sm:$0xff] }
 0x273   :  { %3169 = vrcp.f32 %v1926_v32  ;;  %v1328_v32 = vld [vmem:[%s4710_s2 + $0x328] sm:$0xff] }
 0x274   :  { %3171 = vrcp.f32 %v1923_v35  ;;  %v1341_v35 = vld [vmem:[%s4710_s2 + $0x390] sm:$0xff] }
 0x275   :  { %1978 = vperm.xlu1 %3126, %v1957_v42   ;;  %v1925_v42 = vmul.f32 2.5066283, %v4350_v34  ;;  %3173 = vrcp.f32 %v1928_v47  ;;  %v1927_v34 = vmul.f32 2.5066283, %v4371_v45  ;;  %v1340_v47 = vld [vmem:[%s4710_s2 + $0x388] sm:$0xff] }
 0x276   :  { %v3156_v55 = vpop.eup %3155 }
 0x277   :  { %v1221_v56 = vmul.f32 %v3156_v55, %v4191_v40  ;;  %v1322_v40 = vld [vmem:[%s4710_s2 + $0x2f8] sm:$0xff]  ;;  %v1930_v55 = vmul.f32 2.5066283, %v4463_v20  ;;  %3175 = vrcp.f32 %v1925_v42  ;;  %v1349_v20 = vld [vmem:[%s4710_s2 + $0x3d0] sm:$0xff] }
 0x279   :  { %1983 = vperm.xlu1 %3126, %v1958_v53   ;;  %2940 = vmatmul.mubr.f32.vlgmr.msra.gmra.mxu0 %v1221_v56  ;;  %2088 = vst [vmem:[#allocation4 + $0x10] sm:$0xff] %v1221_v56  ;;  %v1307_v56 = vld [vmem:[%s4710_s2 + $0x280] sm:$0xff]  ;;  %3177 = vrcp.f32 %v1930_v55 }
 0x27a   :  { %v3158_v60 = vpop.eup %3157  ;;  %2978 = vmatpush3.msra.mxu0 %v1306_v57  ;;  %3009 = vmatprep.mubr.msk.f32.mxu0 %vm3272_vm1, %v3271_v2  ;;  %3179 = vrcp.f32 %v1927_v34 }
 0x27b   :  { %v1222_v61 = vmul.f32 %v3158_v60, %v4194_v26  ;;  %2979 = vmatprep.subr.mxu0 %v3271_v2  ;;  %v1303_v26 = vld [vmem:[%s4710_s2 + $0x260] sm:$0xff]  ;;  %v3160_v46 = vpop.eup %3159  ;;  %v1929_v60 = vmul.f32 2.5066283, %v4438_v10  ;;  %v1338_v10 = vld [vmem:[%s4710_s2 + $0x378] sm:$0xff] }
 0x27c   :  { %2980 = vmatpush3.msra.mxu0 %v1305_v59  ;;  %v3162_v49 = vpop.eup %3161  ;;  %v1960_v52 = vmul.f32 -0.5, %v3160_v46  ;;  %v1325_v46 = vld [vmem:[%s4710_s2 + $0x310] sm:$0xff] }
 0x27d   :  { %1988 = vperm.xlu1 %3126, %v1959_v58   ;;  %2975 = vmatmul.mubr.f32.vlgmr.msra.gmra.mxu1 %v1222_v61  ;;  %2089 = vst [vmem:[#allocation4 + $0x18] sm:$0xff] %v1222_v61  ;;  %v3164_v53 = vpop.eup %3163  ;;  %v1955_v54 = vmul.f32 -0.5, %v3162_v49  ;;  %3181 = vrcp.f32 %v1929_v60  ;;  %v1324_v49 = vld [vmem:[%s4710_s2 + $0x308] sm:$0xff] }
 0x27e   :  { %2981 = vmatprep.subr.mxu0 %v3271_v2  ;;  %3013 = vmatpush3.msra.mxu1 %v1322_v40  ;;  %v1961_v57 = vmul.f32 -0.5, %v3164_v53  ;;  %v3166_v58 = vpop.eup %3165 }
 0x27f   :  { %2982 = vmatpush3.msra.mxu0 %v1304_v62  ;;  %3014 = vmatprep.subr.mxu1 %v3271_v2  ;;  %v3168_v59 = vpop.eup %3167  ;;  %v1962_v61 = vmul.f32 -0.5, %v3166_v58  ;;  %v1964_v58 = vcvt.s32.f32 %v1963_v17 }
 0x280   :  { %2983 = vmatprep.subr.mxu0 %v3271_v2  ;;  %3015 = vmatpush3.msra.mxu1 %v1321_v63  ;;  %v3170_v40 = vpop.eup %3169 }
 0x281   :  { %2984 = vmatpush3.msra.mxu0 %v1303_v26  ;;  %3016 = vmatprep.subr.mxu1 %v3271_v2  ;;  %v3172_v62 = vpop.eup %3171  ;;  %v1965_v60 = vmul.f32 %v1964_v58, %v1964_v58 }
 0x282   :  { %2985 = vmatprep.subr.mxu0 %v3271_v2  ;;  %3017 = vmatpush3.msra.mxu1 %v1320_v0  ;;  %v3174_v45 = vpop.eup %3173 }
 0x283   :  { %2986 = vmatpush3.msra.mxu0 %v1302_v1  ;;  %3018 = vmatprep.subr.mxu1 %v3271_v2 }
 0x284   :  { %2987 = vmatprep.subr.mxu0 %v3271_v2  ;;  %3019 = vmatpush3.msra.mxu1 %v1319_v4  ;;  %v3176_v63 = vpop.eup %3175 }
 0x285   :  { %2988 = vmatpush3.msra.mxu0 %v1301_v5  ;;  %3020 = vmatprep.subr.mxu1 %v3271_v2 }
 0x286   :  { %2989 = vmatprep.subr.mxu0 %v3271_v2  ;;  %3021 = vmatpush3.msra.mxu1 %v1318_v7  ;;  %v3178_v0 = vpop.eup %3177 }
 0x287   :  { %2990 = vmatpush3.msra.mxu0 %v1300_v8  ;;  %3022 = vmatprep.subr.mxu1 %v3271_v2  ;;  %v3180_v3 = vpop.eup %3179  ;;  %v1354_v8 = vld [vmem:[%s4710_s2 + $0x3f8] sm:$0xff] }
 0x288   :  { %2991 = vmatprep.subr.mxu0 %v3271_v2  ;;  %3023 = vmatpush3.msra.mxu1 %v1317_v12  ;;  %v1336_v12 = vld [vmem:[%s4710_s2 + $0x368] sm:$0xff] }
 0x289   :  { %2992 = vmatpush3.msra.mxu0 %v1299_v15  ;;  %3024 = vmatprep.subr.mxu1 %v3271_v2  ;;  %v1351_v15 = vld [vmem:[%s4710_s2 + $0x3e0] sm:$0xff] }
 0x28a   :  { %2993 = vmatprep.subr.mxu0 %v3271_v2  ;;  %3025 = vmatpush3.msra.mxu1 %v1316_v16  ;;  %v3182_v4 = vpop.eup %3181  ;;  %v1335_v16 = vld [vmem:[%s4710_s2 + $0x360] sm:$0xff] }
 0x28b   :  { %2994 = vmatpush3.msra.mxu0 %v1298_v18  ;;  %3026 = vmatprep.subr.mxu1 %v3271_v2  ;;  %v1350_v18 = vld [vmem:[%s4710_s2 + $0x3d8] sm:$0xff] }
 0x28c   :  { %2995 = vmatprep.subr.mxu0 %v3271_v2  ;;  %3027 = vmatpush3.msra.mxu1 %v1315_v21  ;;  %v1333_v21 = vld [vmem:[%s4710_s2 + $0x350] sm:$0xff] }
 0x28d   :  { %2996 = vmatpush3.msra.mxu0 %v1297_v22  ;;  %3028 = vmatprep.subr.mxu1 %v3271_v2  ;;  %v1348_v22 = vld [vmem:[%s4710_s2 + $0x3c8] sm:$0xff] }
 0x28e   :  { %2997 = vmatprep.subr.mxu0 %v3271_v2  ;;  %3029 = vmatpush3.msra.mxu1 %v1314_v23  ;;  %v1332_v23 = vld [vmem:[%s4710_s2 + $0x348] sm:$0xff] }
 0x28f   :  { %2998 = vmatpush3.msra.mxu0 %v1296_v24  ;;  %3030 = vmatprep.subr.mxu1 %v3271_v2  ;;  %v1347_v24 = vld [vmem:[%s4710_s2 + $0x3c0] sm:$0xff] }
 0x290   :  { %2999 = vmatprep.subr.mxu0 %v3271_v2  ;;  %3031 = vmatpush3.msra.mxu1 %v1313_v28  ;;  %v1330_v28 = vld [vmem:[%s4710_s2 + $0x338] sm:$0xff] }
 0x291   :  { %3000 = vmatpush3.msra.mxu0 %v1295_v29  ;;  %3032 = vmatprep.subr.mxu1 %v3271_v2  ;;  %v1345_v29 = vld [vmem:[%s4710_s2 + $0x3b0] sm:$0xff] }
 0x292   :  { %3001 = vmatprep.subr.mxu0 %v3271_v2  ;;  %3033 = vmatpush3.msra.mxu1 %v1312_v30  ;;  %v1329_v30 = vld [vmem:[%s4710_s2 + $0x330] sm:$0xff] }
 0x293   :  { %3002 = vmatpush3.msra.mxu0 %v1294_v31  ;;  %3034 = vmatprep.subr.mxu1 %v3271_v2  ;;  %v1344_v31 = vld [vmem:[%s4710_s2 + $0x3a8] sm:$0xff] }
 0x294   :  { %3003 = vmatprep.subr.mxu0 %v3271_v2  ;;  %3035 = vmatpush3.msra.mxu1 %v1311_v33  ;;  %v1343_v33 = vld [vmem:[%s4710_s2 + $0x3a0] sm:$0xff] }
 0x295   :  { %3004 = vmatpush3.msra.mxu0 %v1293_v36  ;;  %3036 = vmatprep.subr.mxu1 %v3271_v2  ;;  %v1327_v36 = vld [vmem:[%s4710_s2 + $0x320] sm:$0xff] }
 0x296   :  { %3005 = vmatprep.subr.mxu0 %v3271_v2  ;;  %3037 = vmatpush3.msra.mxu1 %v1310_v43  ;;  %v1342_v43 = vld [vmem:[%s4710_s2 + $0x398] sm:$0xff] }
 0x297   :  { %3006 = vmatpush3.msra.mxu0 %v1292_v44  ;;  %3038 = vmatprep.subr.mxu1 %v3271_v2  ;;  %v1326_v44 = vld [vmem:[%s4710_s2 + $0x318] sm:$0xff] }
 0x298   :  { %3007 = vmatprep.subr.mxu0 %v3271_v2  ;;  %3039 = vmatpush3.msra.mxu1 %v1309_v50  ;;  %v1323_v50 = vld [vmem:[%s4710_s2 + $0x300] sm:$0xff] }
 0x299   :  { %3008 = vmatpush3.msra.mxu0 %v1291_v51  ;;  %3040 = vmatprep.subr.mxu1 %v3271_v2  ;;  %v1339_v51 = vld [vmem:[%s4710_s2 + $0x380] sm:$0xff] }
 0x29a   :  { %3044 = vmatprep.mubr.msk.f32.mxu1 %vm3272_vm1, %v3271_v2  ;;  %3041 = vmatpush3.msra.mxu1 %v1308_v41 }
 0x29b   :  { %3047 = vmatprep.subr.mxu0 %v3271_v2  ;;  %3042 = vmatprep.subr.mxu1 %v3271_v2 }
 0x29c   :  { %1993 = vperm.xlu1 %3126, %v1960_v52   ;;  %3043 = vmatpush3.msra.mxu1 %v1307_v56 }
 0x29d   :  { %1968 = vperm.xlu0 %3125, %v1955_v54   ;;  %3082 = vmatprep.subr.mxu1 %v3271_v2 }
 0x2a0   :  { %1998 = vperm.xlu1 %3126, %v1961_v57  }
 0x2a1   :  { %2037 = vperm.xlu0 %3125, %v3168_v59  }
 0x2a4   :  { %2003 = vperm.xlu1 %3126, %v1962_v61  }
 0x2a5   :  { %2047 = vperm.xlu0 %3125, %v3170_v40  }
 0x2a8   :  { %2032 = vperm.xlu1 %3126, %v3172_v62  }
 0x2a9   :  { %v1206_v26 = vpop.xlane.xlu1 %1205  ;;  %2057 = vperm.xlu0 %3125, %v3174_v45  }
 0x2aa   :  { %3183 = vrcp.f32 %v1206_v26  ;;  %v1204_v1 = vpop.xlane.xlu0 %1203 }
 0x2ab   :  { %3185 = vrcp.f32 %v1204_v1 }
 0x2ac   :  { %2042 = vperm.xlu1 %3126, %v3176_v63  }
 0x2ad   :  { %2067 = vperm.xlu0 %3125, %v3178_v0  }
 0x2b0   :  { %2052 = vperm.xlu1 %3126, %v3180_v3  }
 0x2b4   :  { %2062 = vperm.xlu1 %3126, %v3182_v4  }
 0x2b7   :  { %v3184_v5 = vpop.eup %3183 }
 0x2b8   :  { %v3186_v6 = vpop.eup %3185  ;;  %v1224_v7 = vmul.f32 %v3184_v5, %v4199_v38  ;;  %v1337_v38 = vld [vmem:[%s4710_s2 + $0x370] sm:$0xff] }
 0x2b9   :  { %v1223_v9 = vmul.f32 %v3186_v6, %v4201_v48  ;;  %v1352_v48 = vld [vmem:[%s4710_s2 + $0x3e8] sm:$0xff]  ;;  %s3274_s2 = smov [#allocation4]  }
 0x2ba   :  { %3045 = vmatmul.mubr.f32.vlgmr.msra.gmra.mxu1 %v1224_v7  ;;  %2091 = vst [vmem:[#allocation4 + $0x28] sm:$0xff] %v1224_v7  ;;  %s2119_s11 = sshll.u32 %s3274_s2, 4  ;;  %s2120_s11 = int_to_ptr.vmem [resolvable:$true] %s2119_s11 }
 0x2bb   :  { %3010 = vmatmul.mubr.f32.vlgmr.msra.gmra.mxu0 %v1223_v9  ;;  %2090 = vst [vmem:[#allocation4 + $0x20] sm:$0xff] %v1223_v9  ;;  %3083 = vmatpush3.msra.mxu1 %v1354_v8  ;;  %s3207_s12 = scalar_lea.vmem %s2120_s11, 1024  ;;  %p3212_p1 = scmp.lt.s32.totalorder %s2120_s11, %s2120_s11 }
 0x2bc   :  { %3048 = vmatpush3.msra.mxu0 %v1338_v10  ;;  %3084 = vmatprep.subr.mxu1 %v3271_v2  ;;  %p3208_p0 = scmp.ne.s32.totalorder %s2120_s11, %s3207_s12  ;;  %p3213_p2 = scmp.lt.s32.totalorder %s3207_s12, %s3207_s12 }
 0x2bd   :  { %3049 = vmatprep.subr.mxu0 %v3271_v2  ;;  %3085 = vmatpush3.msra.mxu1 %v1353_v11 }
 0x2be   :  { %3050 = vmatpush3.msra.mxu0 %v1337_v38  ;;  %3086 = vmatprep.subr.mxu1 %v3271_v2  ;;  %p3214_p3 = por %p3213_p2, %p3212_p1 }
 0x2bf   :  { %3051 = vmatprep.subr.mxu0 %v3271_v2  ;;  %3087 = vmatpush3.msra.mxu1 %v1352_v48 }
 0x2c0   :  { %3052 = vmatpush3.msra.mxu0 %v1336_v12  ;;  %3088 = vmatprep.subr.mxu1 %v3271_v2  ;;  %p3215_p4 = pnand %p3214_p3, %p3208_p0 }
 0x2c1   :  { %3053 = vmatprep.subr.mxu0 %v3271_v2  ;;  %3089 = vmatpush3.msra.mxu1 %v1351_v15 }
 0x2c2   :  { %3054 = vmatpush3.msra.mxu0 %v1335_v16  ;;  %3090 = vmatprep.subr.mxu1 %v3271_v2 }
 0x2c3   :  { %3055 = vmatprep.subr.mxu0 %v3271_v2  ;;  %3091 = vmatpush3.msra.mxu1 %v1350_v18 }
 0x2c4   :  { %3056 = vmatpush3.msra.mxu0 %v1334_v19  ;;  %3092 = vmatprep.subr.mxu1 %v3271_v2 }
 0x2c5   :  { %3057 = vmatprep.subr.mxu0 %v3271_v2  ;;  %3093 = vmatpush3.msra.mxu1 %v1349_v20 }
 0x2c6   :  { %3058 = vmatpush3.msra.mxu0 %v1333_v21  ;;  %3094 = vmatprep.subr.mxu1 %v3271_v2 }
 0x2c7   :  { %3059 = vmatprep.subr.mxu0 %v3271_v2  ;;  %3095 = vmatpush3.msra.mxu1 %v1348_v22 }
 0x2c8   :  { %3060 = vmatpush3.msra.mxu0 %v1332_v23  ;;  %3096 = vmatprep.subr.mxu1 %v3271_v2 }
 0x2c9   :  { %3061 = vmatprep.subr.mxu0 %v3271_v2  ;;  %3097 = vmatpush3.msra.mxu1 %v1347_v24 }
 0x2ca   :  { %3062 = vmatpush3.msra.mxu0 %v1331_v25  ;;  %3098 = vmatprep.subr.mxu1 %v3271_v2 }
 0x2cb   :  { %3063 = vmatprep.subr.mxu0 %v3271_v2  ;;  %3099 = vmatpush3.msra.mxu1 %v1346_v27 }
 0x2cc   :  { %3064 = vmatpush3.msra.mxu0 %v1330_v28  ;;  %3100 = vmatprep.subr.mxu1 %v3271_v2 }
 0x2cd   :  { %3065 = vmatprep.subr.mxu0 %v3271_v2  ;;  %3101 = vmatpush3.msra.mxu1 %v1345_v29 }
 0x2ce   :  { %3066 = vmatpush3.msra.mxu0 %v1329_v30  ;;  %3102 = vmatprep.subr.mxu1 %v3271_v2 }
 0x2cf   :  { %3067 = vmatprep.subr.mxu0 %v3271_v2  ;;  %3103 = vmatpush3.msra.mxu1 %v1344_v31 }
 0x2d0   :  { %3068 = vmatpush3.msra.mxu0 %v1328_v32  ;;  %3104 = vmatprep.subr.mxu1 %v3271_v2 }
 0x2d1   :  { %3069 = vmatprep.subr.mxu0 %v3271_v2  ;;  %3105 = vmatpush3.msra.mxu1 %v1343_v33 }
 0x2d2   :  { %3070 = vmatpush3.msra.mxu0 %v1327_v36  ;;  %3106 = vmatprep.subr.mxu1 %v3271_v2 }
 0x2d3   :  { %3071 = vmatprep.subr.mxu0 %v3271_v2  ;;  %3107 = vmatpush3.msra.mxu1 %v1342_v43 }
 0x2d4   :  { %3072 = vmatpush3.msra.mxu0 %v1326_v44  ;;  %3108 = vmatprep.subr.mxu1 %v3271_v2 }
 0x2d5   :  { %3073 = vmatprep.subr.mxu0 %v3271_v2  ;;  %3109 = vmatpush3.msra.mxu1 %v1341_v35 }
 0x2d6   :  { %3074 = vmatpush3.msra.mxu0 %v1325_v46  ;;  %3110 = vmatprep.subr.mxu1 %v3271_v2 }
 0x2d7   :  { %3075 = vmatprep.subr.mxu0 %v3271_v2  ;;  %3111 = vmatpush3.msra.mxu1 %v1340_v47 }
 0x2d8   :  { %3076 = vmatpush3.msra.mxu0 %v1324_v49  ;;  %3112 = vmatprep.subr.mxu1 %v3271_v2 }
 0x2d9   :  { %3077 = vmatprep.subr.mxu0 %v3271_v2  ;;  %3079 = vmatprep.mubr.msk.f32.mxu0 %vm3272_vm1, %v3271_v2 }
 0x2da   :  { %3078 = vmatpush3.msra.mxu0 %v1323_v50  ;;  %3113 = vmatpush3.msra.mxu1 %v1339_v51 }
 0x2db   :  { %3114 = vmatprep.mubr.msk.f32.mxu1 %vm3272_vm1, %v3271_v2 }
 0x2e9   :  { %v1210_v41 = vpop.xlane.xlu1 %1209 }
 0x2ea   :  { %3187 = vrcp.f32 %v1210_v41  ;;  %v1208_v42 = vpop.xlane.xlu0 %1207 }
 0x2eb   :  { %3189 = vrcp.f32 %v1208_v42 }
 0x2ed   :  { %v1974_v57 = vpop.permute.xlu1 %1973 }
 0x2f7   :  { %v3188_v52 = vpop.eup %3187 }
 0x2f8   :  { %v3190_v53 = vpop.eup %3189  ;;  %v1226_v54 = vmul.f32 %v3188_v52, %v4355_v37  ;;  %v1979_v37 = vpop.permute.xlu1 %1978 }
 0x2f9   :  { %v1225_v55 = vmul.f32 %v3190_v53, %v4357_v39  ;;  %v1421_v56 = vpop.f32.mrf.mxu0  ;;  %v2007_v39 = vmul.f32 %v1974_v57, %v1965_v60  ;;  %v2008_v63 = vmul.f32 %v1979_v37, %v1965_v60 }
 0x2fa   :  { %3115 = vmatmul.mubr.f32.vlgmr.msra.gmra.mxu1 %v1226_v54  ;;  %2093 = vst [vmem:[#allocation4 + $0x38] sm:$0xff] %v1226_v54  ;;  %2078 = vst.msk [vmem:[#allocation2] sm:$0xff] %vm166_vm0, %v1421_v56 }
 0x2fb   :  { %3080 = vmatmul.mubr.f32.vlgmr.msra.gmra.mxu0 %v1225_v55  ;;  %2092 = vst [vmem:[#allocation4 + $0x30] sm:$0xff] %v1225_v55  ;;  %v2871_v34 = vpop.f32.mrf.mxu0  ;;  %v2016_v40 = vmul.f32 1.442695, %v2007_v39  ;;  %v2018_v1 = vmul.f32 1.442695, %v2008_v63 }
 0x2fc   :  { %v1984_v61 = vpop.permute.xlu1 %1983 }
 0x2fd   :  { %v1491_v2 = vpop.f32.mrf.mxu1  ;;  %v2009_v62 = vmul.f32 %v1984_v61, %v1965_v60  ;;  %3191 = vpow2.f32 %v2016_v40 }
 0x2fe   :  { %2079 = vst.msk [vmem:[#allocation2 + $0x8] sm:$0xff] %vm166_vm0, %v1491_v2 }
 0x2ff   :  { %v2906_v59 = vpop.f32.mrf.mxu1  ;;  %v2020_v45 = vmul.f32 1.442695, %v2009_v62 }
 0x300   :  { %v1989_v26 = vpop.permute.xlu1 %1988 }
 0x301   :  { %3193 = vpow2.f32 %v2020_v45  ;;  %v2010_v0 = vmul.f32 %v1989_v26, %v1965_v60 }
 0x302   :  { %3195 = vpow2.f32 %v2018_v1 }
 0x303   :  { %v2022_v3 = vmul.f32 1.442695, %v2010_v0 }
 0x305   :  { %3197 = vpow2.f32 %v2022_v3 }
 0x30a   :  { %v3192_v5 = vpop.eup %3191 }
 0x30e   :  { %v3194_v38 = vpop.eup %3193 }
 0x30f   :  { %v3196_v21 = vpop.eup %3195 }
 0x312   :  { %v3198_v23 = vpop.eup %3197 }
 0x317   :  { %v1994_v4 = vpop.permute.xlu1 %1993 }
 0x318   :  { %v2011_v13 = vmul.f32 %v1994_v4, %v1965_v60  ;;  %v1969_v14 = vpop.permute.xlu0 %1968 }
 0x319   :  { %v2006_v17 = vmul.f32 %v1969_v14, %v1965_v60 }
 0x31a   :  { %v2024_v6 = vmul.f32 1.442695, %v2011_v13 }
 0x31b   :  { %v1999_v7 = vpop.permute.xlu1 %1998  ;;  %v2014_v8 = vmul.f32 1.442695, %v2006_v17 }
 0x31c   :  { %3199 = vpow2.f32 %v2024_v6  ;;  %v2012_v9 = vmul.f32 %v1999_v7, %v1965_v60  ;;  %v2038_v10 = vpop.permute.xlu0 %2037 }
 0x31d   :  { %3201 = vpow2.f32 %v2014_v8  ;;  %v2071_v11 = vmul.f32 %v3192_v5, %v2038_v10 }
 0x31e   :  { %v2026_v48 = vmul.f32 1.442695, %v2012_v9 }
 0x31f   :  { %v2004_v12 = vpop.permute.xlu1 %2003  ;;  %2095 = vst [vmem:[#allocation6 + $0x8] sm:$0xff] %v2071_v11 }
 0x320   :  { %3203 = vpow2.f32 %v2026_v48  ;;  %v2013_v15 = vmul.f32 %v2004_v12, %v1965_v60  ;;  %v2048_v16 = vpop.permute.xlu0 %2047 }
 0x321   :  { %v2073_v18 = vmul.f32 %v3194_v38, %v2048_v16 }
 0x322   :  { %v2028_v19 = vmul.f32 1.442695, %v2013_v15 }
 0x323   :  { %v2033_v20 = vpop.permute.xlu1 %2032  ;;  %2097 = vst [vmem:[#allocation6 + $0x18] sm:$0xff] %v2073_v18 }
 0x324   :  { %3205 = vpow2.f32 %v2028_v19  ;;  %v2058_v27 = vpop.permute.xlu0 %2057 }
 0x327   :  { %v2043_v22 = vpop.permute.xlu1 %2042 }
 0x328   :  { %v2072_v24 = vmul.f32 %v3196_v21, %v2043_v22  ;;  %v2068_v43 = vpop.permute.xlu0 %2067 }
 0x329   :  { %v3200_v25 = vpop.eup %3199 }
 0x32a   :  { %v3202_v28 = vpop.eup %3201  ;;  %2096 = vst [vmem:[#allocation6 + $0x10] sm:$0xff] %v2072_v24  ;;  %v2075_v29 = vmul.f32 %v3200_v25, %v2058_v27 }
 0x32b   :  { %v2070_v30 = vmul.f32 %v3202_v28, %v2033_v20  ;;  %v2053_v31 = vpop.permute.xlu1 %2052 }
 0x32c   :  { %v2074_v32 = vmul.f32 %v3198_v23, %v2053_v31  ;;  %2099 = vst [vmem:[#allocation6 + $0x28] sm:$0xff] %v2075_v29 }
 0x32d   :  { %v3204_v33 = vpop.eup %3203  ;;  %2094 = vst [vmem:[#allocation6] sm:$0xff] %v2070_v30 }
 0x32e   :  { %2098 = vst [vmem:[#allocation6 + $0x20] sm:$0xff] %v2074_v32 }
 0x32f   :  { %v2063_v36 = vpop.permute.xlu1 %2062 }
 0x330   :  { %v2076_v44 = vmul.f32 %v3204_v33, %v2063_v36 }
 0x331   :  { %v3206_v35 = vpop.eup %3205 }
 0x332   :  { %2100 = vst [vmem:[#allocation6 + $0x30] sm:$0xff] %v2076_v44  ;;  %v2077_v46 = vmul.f32 %v3206_v35, %v2068_v43 }
 0x334   :  { %2101 = vst [vmem:[#allocation6 + $0x38] sm:$0xff] %v2077_v46 }
 0x339   :  { %v1561_v47 = vpop.f32.mrf.mxu0 }
 0x33a   :  { %2080 = vst.msk [vmem:[#allocation2 + $0x10] sm:$0xff] %vm166_vm0, %v1561_v47 }
 0x33b   :  { %v2941_v49 = vpop.f32.mrf.mxu0 }
 0x33c   :  { %3218 = shalt.err (!%p3215_p4)
}
 0x33d   :  { %s3275_s13 = smov 128   ;;  %s3276_s14 = smov 8   ;;  %v1631_v50 = vpop.f32.mrf.mxu1 }
 0x33e   :  { %2125 = dma.vmem_to_hbm [thread:$0]  %s2120_s11, 1024, %s4713_s5, [#allocation5], %s3275_s13, %s3275_s13, %s3276_s14   ;;  %2081 = vst.msk [vmem:[#allocation2 + $0x18] sm:$0xff] %vm166_vm0, %v1631_v50 }
 0x33f   :  { %s3277_s17 = smov [#allocation6]   ;;  %v2976_v51 = vpop.f32.mrf.mxu1 }
 0x340   :  { %s2131_s18 = sshll.u32 %s3277_s17, 4  ;;  %s2132_s18 = int_to_ptr.vmem [resolvable:$true] %s2131_s18 }
 0x341   :  { %s3227_s19 = scalar_lea.vmem %s2132_s18, 1024  ;;  %p3232_p6 = scmp.lt.s32.totalorder %s2132_s18, %s2132_s18 }
 0x342   :  { %p3228_p5 = scmp.ne.s32.totalorder %s2132_s18, %s3227_s19  ;;  %p3233_p7 = scmp.lt.s32.totalorder %s3227_s19, %s3227_s19 }
 0x344   :  { %p3234_p8 = por %p3233_p7, %p3232_p6 }
 0x346   :  { %p3235_p9 = pnand %p3234_p8, %p3228_p5 }
 0x348   :  { %3238 = shalt.err (!%p3235_p9)
}
 0x349   :  { %2137 = dma.vmem_to_hbm [thread:$0]  %s2132_s18, 1024, %s4714_s6, [#allocation5], %s3275_s13, %s3275_s13, %s3276_s14  }
 0x34a   :  { %s3278_s5 = smov [#allocation2]  }
 0x34b   :  { %s2107_s22 = sshll.u32 %s3278_s5, 4  ;;  %s2108_s22 = int_to_ptr.vmem [resolvable:$true] %s2107_s22 }
 0x34c   :  { %s3247_s6 = scalar_lea.vmem %s2108_s22, 1024  ;;  %p3252_p11 = scmp.lt.s32.totalorder %s2108_s22, %s2108_s22 }
 0x34d   :  { %p3248_p10 = scmp.ne.s32.totalorder %s2108_s22, %s3247_s6  ;;  %p3253_p12 = scmp.lt.s32.totalorder %s3247_s6, %s3247_s6 }
 0x34f   :  { %p3254_p13 = por %p3253_p12, %p3252_p11 }
 0x351   :  { %p3255_p0 = pnand %p3254_p13, %p3248_p10 }
 0x37a   :  { %v1771_v41 = vpop.f32.mrf.mxu1 }
 0x37b   :  { %2083 = vst.msk [vmem:[#allocation2 + $0x28] sm:$0xff] %vm166_vm0, %v1771_v41  ;;  %v1701_v42 = vpop.f32.mrf.mxu0 }
 0x37c   :  { %2082 = vst.msk [vmem:[#allocation2 + $0x20] sm:$0xff] %vm166_vm0, %v1701_v42  ;;  %v3046_v52 = vpop.f32.mrf.mxu1 }
 0x37d   :  { %v3011_v53 = vpop.f32.mrf.mxu0 }
 0x3ba   :  { %v1911_v54 = vpop.f32.mrf.mxu1 }
 0x3bb   :  { %v1841_v55 = vpop.f32.mrf.mxu0  ;;  %2085 = vst.msk [vmem:[#allocation2 + $0x38] sm:$0xff] %vm166_vm0, %v1911_v54 }
 0x3bc   :  { %2084 = vst.msk [vmem:[#allocation2 + $0x30] sm:$0xff] %vm166_vm0, %v1841_v55  ;;  %v3116_v56 = vpop.f32.mrf.mxu1 }
 0x3bd   :  { %v3081_v34 = vpop.f32.mrf.mxu0 }
 0x3be   :  { %3258 = shalt.err (!%p3255_p0)
}
 0x3bf   :  { %2113 = dma.vmem_to_hbm [thread:$0]  %s2108_s22, 1024, %s4712_s4, [#allocation3], %s3275_s13, %s3275_s13, %s3276_s14  }
 0x3c0   :  { %3267 = dma.done.wait [#allocation3], 1024  }
 0x3c1   :  { %3268 = vsyncadd [#allocation3], 4294966272 }
 0x3c2   :  { %3269 = dma.done.wait [#allocation5], 2048  }
 0x3c3   :  { %3270 = vsyncadd [#allocation5], 4294965248 }
 0x3c4   :  { %2147 = vsyncpa [#allocation3], 1 }
 0x3c5   :  { %2148 = vsyncpa [#allocation5], 1 }

</bundles_post_ra>
